<compile_context>
chip_gen: v7x
topology: tpu7x:2x2x1
jax: 0.10.0
libtpu: 0.0.40
codegen_flags: <defaults>
</compile_context>

<pallas_src>
import functools

import jax
import jax.numpy as jnp
from jax import lax
from jax.experimental import pallas as pl
from jax.experimental.pallas import tpu as pltpu


def _round_up(x, m):
    return ((x + m - 1) // m) * m


def _vmem_capacity_bytes():
    """Physical VMEM per TensorCore; conservative (v7x) fallback if unknown."""
    try:
        return int(pltpu.get_tpu_info().vmem_capacity_bytes)
    except Exception:
        return 64 << 20


def _default_config():
    """(block_k, core_split) per TPU generation.

    v5e/v6e: 1 TensorCore, 128 MiB VMEM  -> no core split, 16K K-tile
             (~34 MB W1 tile, ~68 MB double-buffered, <1.5% per-step overhead).
    v7x:     2 TensorCores, 64 MiB VMEM  -> split K across the 2 cores,
             8K K-tile (~17 MB tile, ~34 MB double-buffered).
    Falls back to the v7x-safe config (correct on every generation).
    """
    if _vmem_capacity_bytes() >= (100 << 20):
        return 16384, 1
    return 8192, 2


def _fc1_stream_kernel(x_ref, w1_ref, o_ref, acc_ref):
    """One (core c, K-tile k) grid step: acc += x_tile @ W1_tile^T.

    W1 is consumed in its PyTorch (out_features, in_features) layout; the MXU
    contracts the K (input-feature) axis of both operands.  On this core's
    last K tile the f32 partial pre-activation is emitted; bias + ReLU + fc2 +
    sigmoid run in the JAX wrapper (they cannot be applied to K-partials).
    """
    k = pl.program_id(1)

    @pl.when(k == 0)
    def _init():
        acc_ref[...] = jnp.zeros_like(acc_ref)

    # TODO(synk): on v7x, dump pl.lower_as_mlir and confirm this trans_b
    # contraction does not insert an XLU vxpose of the W1 tile; if it does,
    # store W1 pre-transposed (K, H_pad128) at prep time instead.
    acc_ref[...] += lax.dot_general(
        x_ref[...],
        w1_ref[...],
        dimension_numbers=(((1,), (1,)), ((), ())),
        preferred_element_type=jnp.float32,
    )

    @pl.when(k == pl.num_programs(1) - 1)
    def _finish():
        o_ref[...] = acc_ref[...][None]


def prepare_params(w1, b1, w2, b2, *, block_k=None, core_split=None,
                   weight_dtype=jnp.bfloat16):
    """One-time (load-time) packing of PyTorch-layout parameters.

    - W1 keeps (out, in) layout (no transpose copy), cast once to bf16.
    - Hidden dim padded only to a multiple of 16 (bf16 sublane packing):
      1029 -> 1040, ~1% padding instead of the previous ~24%.
    - Input dim padded to a multiple of core_split * K-tile (zero padding is
      exact for the matmul).
    - fc2 parameters are tiny and stay in f32 for the wrapper epilogue.
    """
    H, IN = w1.shape
    O, H2 = w2.shape
    assert H2 == H and b1.shape == (H,) and b2.shape == (O,)

    dflt_k, dflt_split = _default_config()
    block_k = dflt_k if block_k is None else block_k
    core_split = dflt_split if core_split is None else core_split

    tk = _round_up(min(block_k, IN), 128)
    in_p = _round_up(IN, tk * core_split)
    h_p = _round_up(H, 16)

    # TODO(synk): optional ~2x further: stream W1 as fp8 (v7x) / int8 (v5e,v6e)
    # with per-row dequant scales applied in the epilogue, accuracy permitting.
    w1_p = jnp.pad(w1.astype(weight_dtype), ((0, h_p - H), (0, in_p - IN)))

    return dict(
        w1=w1_p,
        b1=b1.astype(jnp.float32),
        w2t=jnp.transpose(w2).astype(jnp.float32),
        b2=b2.astype(jnp.float32),
        hidden=H, tk=tk, core_split=core_split,
    )


@functools.partial(jax.jit, static_argnames=("hidden", "tk", "core_split"))
def _mlp_forward(x, w1_p, b1, w2t, b2, *, hidden, tk, core_split):
    out_dtype = x.dtype
    B, IN = x.shape
    h_p, in_p = w1_p.shape
    nkc = in_p // (tk * core_split)          # K tiles per core

    # Pre-cast x to the streaming dtype (it is quantized to bf16 on the MXU
    # anyway) and zero-pad its feature dim — exact for the matmul.
    x = x.astype(w1_p.dtype)
    if in_p != IN:
        x = jnp.pad(x, ((0, 0), (0, in_p - IN)))

    w_bytes = jnp.dtype(w1_p.dtype).itemsize
    x_bytes = jnp.dtype(x.dtype).itemsize

    # Per-core VMEM estimate: double-buffered W1 K-tile dominates.
    est = (2 * h_p * tk * w_bytes            # W1 tile, double buffered
           + 2 * B * tk * x_bytes            # x tile, double buffered
           + 3 * B * h_p * 4                 # acc + double-buffered output
           + (4 << 20))                      # compiler scratch headroom
    vmem_limit = int(min(max(est, 32 << 20),
                         _vmem_capacity_bytes() - (8 << 20)))

    cost = pl.CostEstimate(
        flops=2 * B * h_p * in_p,
        transcendentals=0,
        bytes_accessed=(h_p * in_p * w_bytes + B * in_p * x_bytes
                        + core_split * B * h_p * 4),
    )

    partial_pre = pl.pallas_call(
        _fc1_stream_kernel,
        out_shape=jax.ShapeDtypeStruct((core_split, B, h_p), jnp.float32),
        grid_spec=pltpu.PrefetchScalarGridSpec(
            num_scalar_prefetch=0,
            grid=(core_split, nkc),
            in_specs=[
                # x K-tile (bf16) for this core's K-range.
                pl.BlockSpec((B, tk), lambda c, k: (0, c * nkc + k)),
                # W1 K-tile: full (padded) hidden dim, native (out, in) layout.
                pl.BlockSpec((h_p, tk), lambda c, k: (0, c * nkc + k)),
            ],
            out_specs=pl.BlockSpec((1, B, h_p), lambda c, k: (c, 0, 0)),
            scratch_shapes=[pltpu.VMEM((B, h_p), jnp.float32)],
        ),
        compiler_params=pltpu.CompilerParams(
            dimension_semantics=("parallel", "arbitrary"),
            vmem_limit_bytes=vmem_limit,
        ),
        cost_estimate=cost,
    )(x, w1_p)

    # Tiny epilogue in plain JAX: sum per-core K-partials, then
    # bias + ReLU + fc2 + sigmoid on a (B, H) tensor (~KBs of work).
    pre = jnp.sum(partial_pre, axis=0)[:, :hidden]
    hid = jnp.maximum(pre + b1, 0.0)
    logits = jnp.dot(hid, w2t, preferred_element_type=jnp.float32) + b2
    return jax.nn.sigmoid(logits).astype(out_dtype)


def mlp_forward(x, params):
    """x: (B, IN) f32; params: output of prepare_params."""
    return _mlp_forward(x, params["w1"], params["b1"], params["w2t"],
                        params["b2"], hidden=params["hidden"],
                        tk=params["tk"], core_split=params["core_split"])


def _init_linear(key, out_f, in_f, dtype=jnp.float32):
    """Deterministic PyTorch-style init: U(-1/sqrt(fan_in), 1/sqrt(fan_in))."""
    kw, kb = jax.random.split(key)
    bound = 1.0 / jnp.sqrt(jnp.asarray(in_f, dtype))
    w = jax.random.uniform(kw, (out_f, in_f), dtype, minval=-bound, maxval=bound)
    b = jax.random.uniform(kb, (out_f,), dtype, minval=-bound, maxval=bound)
    return w, b


if __name__ == "__main__":
    # Small stand-in shapes.  Real module: IN = 85*8400 = 714000, HID = 1029, OUT = 2.
    B, IN, HID, OUT = 2, 1024, 1029, 2

    key = jax.random.PRNGKey(0)
    kx, k1, k2 = jax.random.split(key, 3)

    x = jax.random.normal(kx, (B, IN), dtype=jnp.float32)
    w1, b1 = _init_linear(k1, HID, IN)
    w2, b2 = _init_linear(k2, OUT, HID)

    params = prepare_params(w1, b1, w2, b2)
    out = jax.block_until_ready(mlp_forward(x, params))
    assert out.shape == (B, OUT)

    # Exact-math reference: same bf16 quantization of x / W1 as the kernel,
    # all accumulation in f32.
    xq = x.astype(jnp.bfloat16).astype(jnp.float32)
    w1q = w1.astype(jnp.bfloat16).astype(jnp.float32)
    ref_q = jax.nn.sigmoid(jnp.maximum(xq @ w1q.T + b1, 0.0) @ w2.T + b2)
    assert jnp.allclose(out, ref_q, atol=1e-4, rtol=1e-4), "mismatch vs quantized reference"

    # Semantic check against the full-f32 PyTorch math (bf16 weight streaming
    # introduces only a tiny quantization error).
    ref = jax.nn.sigmoid(jnp.maximum(x @ w1.T + b1, 0.0) @ w2.T + b2)
    assert jnp.allclose(out, ref, atol=1e-2), "mismatch vs f32 reference"

    print("KERNEL_OK")
</pallas_src>

<mosaic_0001>
module attributes {stable_mosaic.version = 11 : i64} {
  func.func @_fc1_stream_kernel(%arg0: i32, %arg1: i32, %arg2: memref<2x1024xbf16, #tpu.memory_space<vmem>>, %arg3: memref<1040x1024xbf16, #tpu.memory_space<vmem>>, %arg4: memref<1x2x1040xf32, #tpu.memory_space<vmem>>, %arg5: memref<2x1040xf32, #tpu.memory_space<vmem>>) attributes {dimension_semantics = [#tpu.dimension_semantics<parallel>, #tpu.dimension_semantics<arbitrary>], iteration_bounds = array<i64: 2, 1>, scalar_prefetch = 0 : i64, scratch_operands = 1 : i64, tpu.core_type = #tpu.core_type<tc>, window_params = [{transform_indices = @transform_0, window_bounds = array<i64: 2, 1024>}, {transform_indices = @transform_1, window_bounds = array<i64: 1040, 1024>}, {transform_indices = @transform_2, window_bounds = array<i64: 1, 2, 1040>}]} {
    %c0_i32 = arith.constant 0 : i32
    %0 = arith.cmpi eq, %arg1, %c0_i32 : i32
    %1 = arith.extui %0 : i1 to i32
    %c0_i32_0 = arith.constant 0 : i32
    %2 = arith.cmpi ne, %1, %c0_i32_0 : i32
    scf.if %2 {
      %cst_10 = arith.constant 0.000000e+00 : f32
      %12 = vector.broadcast %cst_10 : f32 to vector<2x1040xf32>
      %c0_11 = arith.constant 0 : index
      %c0_12 = arith.constant 0 : index
      %13 = vector.load %arg5[%c0_11, %c0_12] : memref<2x1040xf32, #tpu.memory_space<vmem>>, vector<2x1040xf32>
      tpu.vector_store %arg5[%c0_11, %c0_12], %12 {strides = array<i32>} : memref<2x1040xf32, #tpu.memory_space<vmem>>, vector<2x1040xf32>,
    } else {
    }
    %c0 = arith.constant 0 : index
    %c0_1 = arith.constant 0 : index
    %3 = vector.load %arg5[%c0, %c0_1] : memref<2x1040xf32, #tpu.memory_space<vmem>>, vector<2x1040xf32>
    %c0_2 = arith.constant 0 : index
    %c0_3 = arith.constant 0 : index
    %4 = vector.load %arg2[%c0_2, %c0_3] : memref<2x1024xbf16, #tpu.memory_space<vmem>>, vector<2x1024xbf16>
    %c0_4 = arith.constant 0 : index
    %c0_5 = arith.constant 0 : index
    %5 = vector.load %arg3[%c0_4, %c0_5] : memref<1040x1024xbf16, #tpu.memory_space<vmem>>, vector<1040x1024xbf16>
    %cst = arith.constant dense<0.000000e+00> : vector<2x1040xf32>
    %6 = tpu.matmul %4, %5, %cst {dimension_numbers = #tpu.dot_dimension_numbers<[1], [1], [0], [0], [0, 0, 1, 0], [], []>} : vector<2x1024xbf16>, vector<1040x1024xbf16>, vector<2x1040xf32> -> vector<2x1040xf32>
    %7 = arith.addf %3, %6 : vector<2x1040xf32>
    %c0_6 = arith.constant 0 : index
    %c0_7 = arith.constant 0 : index
    %8 = vector.load %arg5[%c0_6, %c0_7] : memref<2x1040xf32, #tpu.memory_space<vmem>>, vector<2x1040xf32>
    tpu.vector_store %arg5[%c0_6, %c0_7], %7 {strides = array<i32>} : memref<2x1040xf32, #tpu.memory_space<vmem>>, vector<2x1040xf32>,
    %c0_i32_8 = arith.constant 0 : i32
    %9 = arith.cmpi eq, %arg1, %c0_i32_8 : i32
    %10 = arith.extui %9 : i1 to i32
    %c0_i32_9 = arith.constant 0 : i32
    %11 = arith.cmpi ne, %10, %c0_i32_9 : i32
    scf.if %11 {
      %c0_10 = arith.constant 0 : index
      %c0_11 = arith.constant 0 : index
      %12 = vector.load %arg5[%c0_10, %c0_11] : memref<2x1040xf32, #tpu.memory_space<vmem>>, vector<2x1040xf32>
      %13 = vector.shape_cast %12 : vector<2x1040xf32> to vector<1x2x1040xf32>
      %c0_12 = arith.constant 0 : index
      %c0_13 = arith.constant 0 : index
      %c0_14 = arith.constant 0 : index
      %14 = vector.load %arg4[%c0_12, %c0_13, %c0_14] : memref<1x2x1040xf32, #tpu.memory_space<vmem>>, vector<1x2x1040xf32>
      tpu.vector_store %arg4[%c0_12, %c0_13, %c0_14], %13 {strides = array<i32>} : memref<1x2x1040xf32, #tpu.memory_space<vmem>>, vector<1x2x1040xf32>,
    } else {
    }
    return
  }
  func.func @transform_0(%arg0: i32, %arg1: i32) -> (i32, i32) {
    %c1_i32 = arith.constant 1 : i32
    %0 = arith.muli %arg0, %c1_i32 : i32
    %1 = arith.addi %0, %arg1 : i32
    %c0_i32 = arith.constant 0 : i32
    %c0_i32_0 = arith.constant 0 : i32
    return %c0_i32, %1 : i32, i32
  }
  func.func @transform_1(%arg0: i32, %arg1: i32) -> (i32, i32) {
    %c1_i32 = arith.constant 1 : i32
    %0 = arith.muli %arg0, %c1_i32 : i32
    %1 = arith.addi %0, %arg1 : i32
    %c0_i32 = arith.constant 0 : i32
    %c0_i32_0 = arith.constant 0 : i32
    return %c0_i32, %1 : i32, i32
  }
  func.func @transform_2(%arg0: i32, %arg1: i32) -> (i32, i32, i32) {
    %c0_i32 = arith.constant 0 : i32
    %c0_i32_0 = arith.constant 0 : i32
    %c0_i32_1 = arith.constant 0 : i32
    return %arg0, %c0_i32, %c0_i32_0 : i32, i32, i32
  }
}

</mosaic_0001>

<bundles_post_ra>
// kernel: _mlp_forward.1
= control target key start
LH: loop header
LB: loop body
LE: loop exit
PB: predicated region body
PF: predicated region fallthrough
CT: control target
= control target key end

     0   :  { %7 = vsyncpa [#allocation4], 0  ;;  %s5878_s0 = inlined_call_operand.vmem [shape: bf16[2,2048], index: 0, kind: input, shape index: {}]   ;;  %s5879_s1 = inlined_call_operand.hbm [shape: bf16[1040,2048], index: 1, kind: input, shape index: {}]   ;;  %s5880_s2 = inlined_call_operand.vmem [shape: f32[2,2,1040], index: 2, kind: output, shape index: {}]  }
   0x1   :  { %9 = vsyncpa [#allocation4 + $0x1], 0  ;;  %s5126_s9 = smov 0   ;;  %s5128_s10 = smov 0  }
   0x2   :  { %s5130_s11 = smov 0   ;;  %s5132_s12 = smov 0  }
   0x3   :  { %s5134_s13 = smov 0   ;;  %s5136_s14 = smov 0  }
   0x4 LB: > { %s4368_s15 = sadd.s32 4294967295, %s5102_s14   ;;  %s27_s16 = sadd.s32 1, %s5098_s13  ;;  %s5102_s14 = sphi %s5136_s14, %s15_s14   ;;  %s5098_s13 = sphi %s5134_s13, %s5888_s13   ;;  %s5094_s12 = sphi %s5132_s12, %s5887_s12   ;;  %s5090_s11 = sphi %s5130_s11, %s5886_s11   ;;  %s5086_s10 = sphi %s5128_s10, %s5885_s10   ;;  %s5082_s9 = sphi %s5126_s9, %s5884_s9  }
   0x5   : > { %p29_p0 = scmp.ge.s32.totalorder %s27_s16, 2  ;;  %s64_s17 = sadd.s32 1, %s5090_s11 }
   0x6   : > { %p71_p1 = scmp.ne.s32.totalorder %s5090_s11, %s5086_s10  ;;  %p72_p2 = scmp.eq.s32.totalorder %s5102_s14, 0 }
   0x7   : > { %s5890_s16 = smov (%p29_p0, %s27_s16), 0  ;;  %p77_p4 = scmp.ne.s32.totalorder %s5086_s10, %s5082_s9 }
   0x8   : > { %p73_p3 = por %p72_p2, %p71_p1  ;;  %s61_s18 = ssub.s32 %s5098_s13, %s5890_s16 }
   0x9   : > { %p78_p5 = scmp.eq.s32.totalorder %s4368_s15, 0  ;;  %p62_p6 = scmp.eq.s32.totalorder %s61_s18, 0 }
   0xa   : > { %p4966_p8 = scmp.lt.s32.totalorder %s5102_s14, 2  ;;  %s137_s21 = sand.u32 1, %s5090_s11  }
   0xb   : > { %p5165_p7 = por %p78_p5, %p77_p4  ;;  %s4899_s22 = sshll.u32 %s5098_s13, 9 }
   0xc   : > { %s5171_s20 = scalar_select %p62_p6, %s5090_s11, %s64_s17  }
   0xd   : > { %s4957_s23 = smul.u32 4160, %s137_s21  ;;  %s5178_s26 = scalar_lea.hbm %s5879_s1, %s4899_s22 }
   0xe   : > { %p5180_p9 = pnand %p4966_p8, %p73_p3  ;;  %s5187_s30 = scalar_lea.sflag [#allocation4], %s137_s21 }
   0xf   : > { %s141_s28 = scalar_lea.vmem [#allocation3], %s4957_s23  ;;  %s5022_s3 = scalar_lea.hbm %s5178_s26, 66560 }
  0x10   : > { %s149_s29 = sshll.u32 %s141_s28, 4  ;;  %p5023_p11 = scmp.ne.s32.totalorder %s5178_s26, %s5022_s3  ;;  %s5184_s29 = int_to_ptr.vmem [resolvable:$true] %s149_s29 }
  0x11   : > { %p5024_p12 = pneg %p5180_p9  ;;  %s5027_s6 = scalar_lea.hbm %s5879_s1, 133120 }
  0x12   : > { %p5028_p1 = scmp.lt.u32.totalorder %s5178_s26, %s5879_s1  ;;  %p5029_p2 = scmp.lt.u32.totalorder %s5027_s6, %s5022_s3 }
  0x13   : > { %p5025_p13 = pnand %p5024_p12, %p5023_p11  ;;  %p5031_p4 = scmp.lt.u32.totalorder %s5022_s3, %s5178_s26 }
  0x14   : > { %p5030_p3 = por %p5029_p2, %p5028_p1 }
  0x15   : > { %p5026_p0 = pneg %p5025_p13 }
  0x16   : > { %p5032_p5 = por %p5031_p4, %p5030_p3 }
  0x18   : > { %p5033_p6 = pnand %p5032_p5, %p5026_p0 }
  0x1a   : > { %5036 = shalt.err (!%p5033_p6)
}
  0x1b   : > { %s5037_s9 = scalar_lea.vmem %s5184_s29, 66560  ;;  %s5104_s15 = smov [#allocation3]  }
  0x1c   : > { %p5038_p8 = scmp.ne.s32.totalorder %s5184_s29, %s5037_s9  ;;  %s5042_s17 = sshll.u32 %s5104_s15, 4  ;;  %s5043_s17 = int_to_ptr.vmem [resolvable:$false] %s5042_s17 }
  0x1d   : > { %s5044_s18 = scalar_lea.vmem %s5043_s17, 133120  ;;  %p5045_p10 = scmp.lt.s32.totalorder %s5184_s29, %s5043_s17 }
  0x1e   : > { %p5040_p11 = pnand %p5038_p8, %p5024_p12  ;;  %p5046_p1 = scmp.lt.s32.totalorder %s5044_s18, %s5037_s9 }
  0x20   : > { %p5041_p13 = pneg %p5040_p11  ;;  %p5047_p2 = por %p5046_p1, %p5045_p10 }
  0x22   : > { %p5048_p3 = pnand %p5047_p2, %p5041_p13 }
  0x24   : > { %5051 = shalt.err (!%p5048_p3)
}
  0x25   : > { %s5105_s21 = smov 1024   ;;  %s5106_s22 = smov 512  }
  0x26   : > { %s5107_s23 = smov 32   ;;  %p157_p12 = scmp.lt.s32.totalorder %s5102_s14, 3 }
  0x27   : > { %4965 = dma.hbm_to_vmem [thread:$0]  (!%p5180_p9), %s5178_s26, 66560, %s5184_s29, %s5187_s30, %s5105_s21, %s5106_s22, %s5107_s23  }
  0x28   : > { %p5883_p0 = scmp.ge.s32.totalorder %s5102_s14, 1 }
  0x2a   : > { %p158_p4 = pnand %p5883_p0, %p157_p12 }
  0x2b   : > { %s163_s24 = sand.u32 (!%p158_p4), 1, %s5086_s10  }
  0x2c   : > { %161 = sbr.rel (%p158_p4) target bundleno = 1329 (0x531), region = 28  ;;  %s164_s28 = scalar_lea.sflag (!%p158_p4), [#allocation4], %s163_s24 }
  0x2d   : > { %s4958_s25 = smul.u32 (!%p158_p4), 4160, %s163_s24 }
  0x2f   : > { %s5219_s3 = scalar_lea.vmem (!%p158_p4), [#allocation3], %s4958_s25 }
  0x33   : > { %5077 = dma.done.wait (%p5165_p7), %s164_s28, 66560  }
  0x34   : > { %5079 = vsyncadd (%p5165_p7), %s164_s28, 4294900736  ;;  %v220_v0 = vld [vmem:[%s5219_s3] sm:$0xff]  ;;  %s4375_s19 = sshll.u32 %s5094_s12, 3  ;;  %v5108_v22 = vmov 1966171168   ;;  %v745_v24 = vlaneseq  ;;  %p202_p9 = scmp.lt.s32.totalorder %s5094_s12, 1 }
  0x35   : > { %v224_v1 = vld [vmem:[%s5219_s3 + $0x20] sm:$0xff]  ;;  %p195_p7 = scmp.lt.s32.totalorder %s4375_s19, 15  ;;  %v743_v23 = vunpack.c.l.s4 %v5108_v22  ;;  %vm214_vm0 = vcmask 123904  }
  0x36   : > { %v348_v2 = vld [vmem:[%s5219_s3 + $0x400] sm:$0xff]  ;;  %v4378_v3 = vcombine.high %v220_v0, %v224_v1  ;;  %v4377_v5 = vcombine.low %v220_v0, %v224_v1  ;;  %v5240_v28 = vshrl.u32 %v745_v24, 7  ;;  %s5894_s12 = smov (!%p202_p9, %s5094_s12), 1 }
  0x37   : > { %v352_v4 = vld [vmem:[%s5219_s3 + $0x420] sm:$0xff]  ;;  %s5892_s19 = smov (!%p195_p7, %s4375_s19), 15  ;;  %v744_v27 = vunpack.c.0.s8 %v743_v23  ;;  %s4959_s30 = smul.u32 18, %s5894_s12 }
  0x38   : > { %v228_v6 = vld [vmem:[%s5219_s3 + $0x40] sm:$0xff]  ;;  %v4506_v8 = vcombine.high %v348_v2, %v352_v4  ;;  %v4505_v9 = vcombine.low %v348_v2, %v352_v4  ;;  %3398 = vmatprep.subr.bf16.mxu0 %v4378_v3  ;;  %s197_s29 = scalar_lea.vmem %s5878_s0, %s5892_s19 }
  0x39   : > { %v232_v7 = vld [vmem:[%s5219_s3 + $0x60] sm:$0xff]  ;;  %3399 = vmatpush1.bf16.xpose.msra.mxu0 %v4377_v5  ;;  %v5248_v35 = vsub.s32 %v744_v27, %v5240_v28  ;;  %v5250_v36 = vld [vmem:[%s197_s29] sm:$0xff]  ;;  %s5689_s6 = scalar_lea.vmem %s5880_s2, %s4959_s30 }
  0x3a   : > { %v4386_v10 = vcombine.high %v228_v6, %v232_v7  ;;  %v356_v11 = vld [vmem:[%s5219_s3 + $0x440] sm:$0xff]  ;;  %3562 = vmatprep.subr.bf16.mxu1 %v4506_v8  ;;  %v4385_v18 = vcombine.low %v228_v6, %v232_v7 }
  0x3b   : > { %v360_v12 = vld [vmem:[%s5219_s3 + $0x460] sm:$0xff]  ;;  %3563 = vmatpush1.bf16.xpose.msra.mxu1 %v4505_v9  ;;  %v5256_v39 = vrot.slane %v5250_v36, %v5248_v35 }
  0x3c   : > { %v4514_v13 = vcombine.high %v356_v11, %v360_v12  ;;  %3400 = vmatprep.subr.bf16.mxu0 %v4386_v10  ;;  %v236_v14 = vld [vmem:[%s5219_s3 + $0x80] sm:$0xff]  ;;  %v4513_v19 = vcombine.low %v356_v11, %v360_v12 }
  0x3d   : > { %v240_v15 = vld [vmem:[%s5219_s3 + $0xa0] sm:$0xff]  ;;  %v756_v43 = vcombine.high %v5256_v39, %v5256_v39 }
  0x3e   : > { %3564 = vmatprep.subr.bf16.mxu1 %v4514_v13  ;;  %v364_v16 = vld [vmem:[%s5219_s3 + $0x480] sm:$0xff]  ;;  %v4394_v20 = vcombine.high %v236_v14, %v240_v15  ;;  %v4393_v31 = vcombine.low %v236_v14, %v240_v15 }
  0x3f   : > { %v368_v17 = vld [vmem:[%s5219_s3 + $0x4a0] sm:$0xff]  ;;  %v5263_v47 = vrot.slane %v756_v43, %v5248_v35 }
  0x40   : > { %v4522_v21 = vcombine.high %v364_v16, %v368_v17  ;;  %v244_v25 = vld [vmem:[%s5219_s3 + $0xc0] sm:$0xff]  ;;  %v4521_v32 = vcombine.low %v364_v16, %v368_v17 }
  0x41   : > { %3401 = vmatpush1.bf16.xpose.msra.mxu0 %v4385_v18  ;;  %v248_v26 = vld [vmem:[%s5219_s3 + $0xe0] sm:$0xff]  ;;  %3430 = vmatprep.mubr.bf16.mxu0 %v5263_v47 }
  0x42   : > { %3402 = vmatprep.subr.bf16.mxu0 %v4394_v20  ;;  %v372_v29 = vld [vmem:[%s5219_s3 + $0x4c0] sm:$0xff]  ;;  %v4402_v33 = vcombine.high %v244_v25, %v248_v26  ;;  %v4401_v42 = vcombine.low %v244_v25, %v248_v26  ;;  %3594 = vmatprep.mubr.bf16.mxu1 %v5263_v47 }
  0x43   : > { %3565 = vmatpush1.bf16.xpose.msra.mxu1 %v4513_v19  ;;  %v376_v30 = vld [vmem:[%s5219_s3 + $0x4e0] sm:$0xff] }
  0x44   : > { %3566 = vmatprep.subr.bf16.mxu1 %v4522_v21  ;;  %v4530_v34 = vcombine.high %v372_v29, %v376_v30  ;;  %v252_v37 = vld [vmem:[%s5219_s3 + $0x100] sm:$0xff]  ;;  %v4529_v44 = vcombine.low %v372_v29, %v376_v30 }
  0x45   : > { %v256_v38 = vld [vmem:[%s5219_s3 + $0x120] sm:$0xff] }
  0x46   : > { %v380_v40 = vld [vmem:[%s5219_s3 + $0x500] sm:$0xff]  ;;  %v4410_v45 = vcombine.high %v252_v37, %v256_v38  ;;  %v4409_v52 = vcombine.low %v252_v37, %v256_v38 }
  0x47   : > { %v384_v41 = vld [vmem:[%s5219_s3 + $0x520] sm:$0xff] }
  0x48   : > { %v4538_v46 = vcombine.high %v380_v40, %v384_v41  ;;  %v260_v48 = vld [vmem:[%s5219_s3 + $0x140] sm:$0xff]  ;;  %v4537_v53 = vcombine.low %v380_v40, %v384_v41 }
  0x49   : > { %3403 = vmatpush1.bf16.xpose.msra.mxu0 %v4393_v31  ;;  %v264_v49 = vld [vmem:[%s5219_s3 + $0x160] sm:$0xff] }
  0x4a   : > { %3404 = vmatprep.subr.bf16.mxu0 %v4402_v33  ;;  %v388_v50 = vld [vmem:[%s5219_s3 + $0x540] sm:$0xff]  ;;  %v4418_v54 = vcombine.high %v260_v48, %v264_v49  ;;  %v4417_v60 = vcombine.low %v260_v48, %v264_v49 }
  0x4b   : > { %3567 = vmatpush1.bf16.xpose.msra.mxu1 %v4521_v32  ;;  %v392_v51 = vld [vmem:[%s5219_s3 + $0x560] sm:$0xff] }
  0x4c   : > { %3568 = vmatprep.subr.bf16.mxu1 %v4530_v34  ;;  %v4546_v55 = vcombine.high %v388_v50, %v392_v51  ;;  %v268_v56 = vld [vmem:[%s5219_s3 + $0x180] sm:$0xff]  ;;  %v4545_v61 = vcombine.low %v388_v50, %v392_v51 }
  0x4d   : > { %v272_v57 = vld [vmem:[%s5219_s3 + $0x1a0] sm:$0xff] }
  0x4e   : > { %v396_v58 = vld [vmem:[%s5219_s3 + $0x580] sm:$0xff]  ;;  %v4426_v62 = vcombine.high %v268_v56, %v272_v57  ;;  %v4425_v4 = vcombine.low %v268_v56, %v272_v57 }
  0x4f   : > { %v400_v59 = vld [vmem:[%s5219_s3 + $0x5a0] sm:$0xff] }
  0x50   : > { %v4554_v63 = vcombine.high %v396_v58, %v400_v59  ;;  %v276_v0 = vld [vmem:[%s5219_s3 + $0x1c0] sm:$0xff]  ;;  %v4553_v5 = vcombine.low %v396_v58, %v400_v59 }
  0x51   : > { %3405 = vmatpush1.bf16.xpose.msra.mxu0 %v4401_v42  ;;  %v280_v1 = vld [vmem:[%s5219_s3 + $0x1e0] sm:$0xff] }
  0x52   : > { %3406 = vmatprep.subr.bf16.mxu0 %v4410_v45  ;;  %v404_v2 = vld [vmem:[%s5219_s3 + $0x5c0] sm:$0xff]  ;;  %v4434_v6 = vcombine.high %v276_v0, %v280_v1  ;;  %v4433_v12 = vcombine.low %v276_v0, %v280_v1 }
  0x53   : > { %3569 = vmatpush1.bf16.xpose.msra.mxu1 %v4529_v44  ;;  %v408_v3 = vld [vmem:[%s5219_s3 + $0x5e0] sm:$0xff] }
  0x54   : > { %3570 = vmatprep.subr.bf16.mxu1 %v4538_v46  ;;  %v4562_v7 = vcombine.high %v404_v2, %v408_v3  ;;  %v284_v8 = vld [vmem:[%s5219_s3 + $0x200] sm:$0xff]  ;;  %v4561_v13 = vcombine.low %v404_v2, %v408_v3 }
  0x55   : > { %v288_v9 = vld [vmem:[%s5219_s3 + $0x220] sm:$0xff] }
  0x56   : > { %v412_v10 = vld [vmem:[%s5219_s3 + $0x600] sm:$0xff]  ;;  %v4442_v14 = vcombine.high %v284_v8, %v288_v9  ;;  %v4441_v20 = vcombine.low %v284_v8, %v288_v9 }
  0x57   : > { %v416_v11 = vld [vmem:[%s5219_s3 + $0x620] sm:$0xff] }
  0x58   : > { %v4570_v15 = vcombine.high %v412_v10, %v416_v11  ;;  %v292_v16 = vld [vmem:[%s5219_s3 + $0x240] sm:$0xff]  ;;  %v4569_v21 = vcombine.low %v412_v10, %v416_v11 }
  0x59   : > { %3407 = vmatpush1.bf16.xpose.msra.mxu0 %v4409_v52  ;;  %v296_v17 = vld [vmem:[%s5219_s3 + $0x260] sm:$0xff] }
  0x5a   : > { %3408 = vmatprep.subr.bf16.mxu0 %v4418_v54  ;;  %v420_v18 = vld [vmem:[%s5219_s3 + $0x640] sm:$0xff]  ;;  %v4450_v22 = vcombine.high %v292_v16, %v296_v17  ;;  %v4449_v29 = vcombine.low %v292_v16, %v296_v17  ;;  %v353_v16 = vld [vmem:[%s5219_s3 + $0x428] sm:$0xff] }
  0x5b   : > { %3571 = vmatpush1.bf16.xpose.msra.mxu1 %v4537_v53  ;;  %v424_v19 = vld [vmem:[%s5219_s3 + $0x660] sm:$0xff] }
  0x5c   : > { %3572 = vmatprep.subr.bf16.mxu1 %v4546_v55  ;;  %v4578_v23 = vcombine.high %v420_v18, %v424_v19  ;;  %v300_v24 = vld [vmem:[%s5219_s3 + $0x280] sm:$0xff]  ;;  %v4577_v30 = vcombine.low %v420_v18, %v424_v19 }
  0x5d   : > { %v304_v25 = vld [vmem:[%s5219_s3 + $0x2a0] sm:$0xff] }
  0x5e   : > { %v428_v26 = vld [vmem:[%s5219_s3 + $0x680] sm:$0xff]  ;;  %v4458_v31 = vcombine.high %v300_v24, %v304_v25  ;;  %v4457_v40 = vcombine.low %v300_v24, %v304_v25  ;;  %v357_v24 = vld [vmem:[%s5219_s3 + $0x448] sm:$0xff] }
  0x5f   : > { %v432_v27 = vld [vmem:[%s5219_s3 + $0x6a0] sm:$0xff]  ;;  %v361_v25 = vld [vmem:[%s5219_s3 + $0x468] sm:$0xff] }
  0x60   : > { %v4586_v32 = vcombine.high %v428_v26, %v432_v27  ;;  %v308_v33 = vld [vmem:[%s5219_s3 + $0x2c0] sm:$0xff]  ;;  %v4585_v41 = vcombine.low %v428_v26, %v432_v27 }
  0x61   : > { %3409 = vmatpush1.bf16.xpose.msra.mxu0 %v4417_v60  ;;  %v312_v34 = vld [vmem:[%s5219_s3 + $0x2e0] sm:$0xff] }
  0x62   : > { %3410 = vmatprep.subr.bf16.mxu0 %v4426_v62  ;;  %v436_v37 = vld [vmem:[%s5219_s3 + $0x6c0] sm:$0xff]  ;;  %v4466_v42 = vcombine.high %v308_v33, %v312_v34  ;;  %v4465_v49 = vcombine.low %v308_v33, %v312_v34  ;;  %v365_v33 = vld [vmem:[%s5219_s3 + $0x488] sm:$0xff] }
  0x63   : > { %3573 = vmatpush1.bf16.xpose.msra.mxu1 %v4545_v61  ;;  %v440_v38 = vld [vmem:[%s5219_s3 + $0x6e0] sm:$0xff]  ;;  %v369_v34 = vld [vmem:[%s5219_s3 + $0x4a8] sm:$0xff] }
  0x64   : > { %3574 = vmatprep.subr.bf16.mxu1 %v4554_v63  ;;  %v4594_v43 = vcombine.high %v436_v37, %v440_v38  ;;  %v316_v44 = vld [vmem:[%s5219_s3 + $0x300] sm:$0xff]  ;;  %v4593_v50 = vcombine.low %v436_v37, %v440_v38  ;;  %v4515_v38 = vcombine.low %v357_v24, %v361_v25 }
  0x65   : > { %v320_v45 = vld [vmem:[%s5219_s3 + $0x320] sm:$0xff] }
  0x66   : > { %v444_v46 = vld [vmem:[%s5219_s3 + $0x700] sm:$0xff]  ;;  %v4474_v51 = vcombine.high %v316_v44, %v320_v45  ;;  %v4473_v57 = vcombine.low %v316_v44, %v320_v45  ;;  %v373_v44 = vld [vmem:[%s5219_s3 + $0x4c8] sm:$0xff] }
  0x67   : > { %v448_v48 = vld [vmem:[%s5219_s3 + $0x720] sm:$0xff]  ;;  %v377_v45 = vld [vmem:[%s5219_s3 + $0x4e8] sm:$0xff] }
  0x68   : > { %v4602_v52 = vcombine.high %v444_v46, %v448_v48  ;;  %v324_v53 = vld [vmem:[%s5219_s3 + $0x340] sm:$0xff]  ;;  %v4601_v58 = vcombine.low %v444_v46, %v448_v48  ;;  %v4523_v48 = vcombine.low %v365_v33, %v369_v34 }
  0x69   : > { %3411 = vmatpush1.bf16.xpose.msra.mxu0 %v4425_v4  ;;  %v328_v54 = vld [vmem:[%s5219_s3 + $0x360] sm:$0xff] }
  0x6a   : > { %3412 = vmatprep.subr.bf16.mxu0 %v4434_v6  ;;  %v452_v55 = vld [vmem:[%s5219_s3 + $0x740] sm:$0xff]  ;;  %v4482_v59 = vcombine.high %v324_v53, %v328_v54  ;;  %v4481_v1 = vcombine.low %v324_v53, %v328_v54  ;;  %v381_v53 = vld [vmem:[%s5219_s3 + $0x508] sm:$0xff] }
  0x6b   : > { %3575 = vmatpush1.bf16.xpose.msra.mxu1 %v4553_v5  ;;  %v456_v56 = vld [vmem:[%s5219_s3 + $0x760] sm:$0xff]  ;;  %v385_v54 = vld [vmem:[%s5219_s3 + $0x528] sm:$0xff] }
  0x6c   : > { %3576 = vmatprep.subr.bf16.mxu1 %v4562_v7  ;;  %v4610_v60 = vcombine.high %v452_v55, %v456_v56  ;;  %v332_v61 = vld [vmem:[%s5219_s3 + $0x380] sm:$0xff]  ;;  %v4609_v2 = vcombine.low %v452_v55, %v456_v56  ;;  %v4531_v56 = vcombine.low %v373_v44, %v377_v45 }
  0x6d   : > { %v336_v62 = vld [vmem:[%s5219_s3 + $0x3a0] sm:$0xff] }
  0x6e   : > { %v460_v63 = vld [vmem:[%s5219_s3 + $0x780] sm:$0xff]  ;;  %v4490_v3 = vcombine.high %v332_v61, %v336_v62  ;;  %v4489_v9 = vcombine.low %v332_v61, %v336_v62  ;;  %v389_v61 = vld [vmem:[%s5219_s3 + $0x548] sm:$0xff] }
  0x6f   : > { %v464_v0 = vld [vmem:[%s5219_s3 + $0x7a0] sm:$0xff]  ;;  %v393_v62 = vld [vmem:[%s5219_s3 + $0x568] sm:$0xff] }
  0x70   : > { %v4618_v4 = vcombine.high %v460_v63, %v464_v0  ;;  %v340_v5 = vld [vmem:[%s5219_s3 + $0x3c0] sm:$0xff]  ;;  %v4617_v10 = vcombine.low %v460_v63, %v464_v0  ;;  %v4539_v0 = vcombine.low %v381_v53, %v385_v54 }
  0x71   : > { %3413 = vmatpush1.bf16.xpose.msra.mxu0 %v4433_v12  ;;  %v344_v6 = vld [vmem:[%s5219_s3 + $0x3e0] sm:$0xff] }
  0x72   : > { %3414 = vmatprep.subr.bf16.mxu0 %v4442_v14  ;;  %v468_v7 = vld [vmem:[%s5219_s3 + $0x7c0] sm:$0xff]  ;;  %v4498_v11 = vcombine.high %v340_v5, %v344_v6  ;;  %v225_v14 = vld [vmem:[%s5219_s3 + $0x28] sm:$0xff]  ;;  %v4497_v17 = vcombine.low %v340_v5, %v344_v6 }
  0x73   : > { %3577 = vmatpush1.bf16.xpose.msra.mxu1 %v4561_v13  ;;  %v472_v8 = vld [vmem:[%s5219_s3 + $0x7e0] sm:$0xff]  ;;  %v221_v13 = vld [vmem:[%s5219_s3 + $0x8] sm:$0xff] }
  0x74   : > { %3578 = vmatprep.subr.bf16.mxu1 %v4570_v15  ;;  %v4626_v12 = vcombine.high %v468_v7, %v472_v8  ;;  %v349_v15 = vld [vmem:[%s5219_s3 + $0x408] sm:$0xff]  ;;  %v4625_v18 = vcombine.low %v468_v7, %v472_v8  ;;  %v4380_v19 = vcombine.high %v221_v13, %v225_v14  ;;  %v4379_v26 = vcombine.low %v221_v13, %v225_v14 }
  0x75   : > { %v4507_v27 = vcombine.low %v349_v15, %v353_v16  ;;  %v397_v5 = vld [vmem:[%s5219_s3 + $0x588] sm:$0xff]  ;;  %v4547_v8 = vcombine.low %v389_v61, %v393_v62 }
  0x76   : > { %v401_v6 = vld [vmem:[%s5219_s3 + $0x5a8] sm:$0xff] }
  0x77   : > { %v405_v13 = vld [vmem:[%s5219_s3 + $0x5c8] sm:$0xff] }
  0x78   : > { %v409_v14 = vld [vmem:[%s5219_s3 + $0x5e8] sm:$0xff] }
  0x79   : > { %3415 = vmatpush1.bf16.xpose.msra.mxu0 %v4441_v20  ;;  %v4508_v20 = vcombine.high %v349_v15, %v353_v16  ;;  %v4555_v16 = vcombine.low %v397_v5, %v401_v6 }
  0x7a   : > { %3416 = vmatprep.subr.bf16.mxu0 %v4450_v22  ;;  %v233_v22 = vld [vmem:[%s5219_s3 + $0x68] sm:$0xff] }
  0x7b   : > { %3579 = vmatpush1.bf16.xpose.msra.mxu1 %v4569_v21  ;;  %v229_v21 = vld [vmem:[%s5219_s3 + $0x48] sm:$0xff] }
  0x7c   : > { %3580 = vmatprep.subr.bf16.mxu1 %v4578_v23  ;;  %v5319_v23 = vrot.slane %v5256_v39, %v5248_v35  ;;  %v237_v39 = vld [vmem:[%s5219_s3 + $0x88] sm:$0xff]  ;;  %v4387_v37 = vcombine.low %v229_v21, %v233_v22 }
  0x81   : > { %3417 = vmatpush1.bf16.xpose.msra.mxu0 %v4449_v29  ;;  %v4388_v29 = vcombine.high %v229_v21, %v233_v22  ;;  %v413_v21 = vld [vmem:[%s5219_s3 + $0x608] sm:$0xff] }
  0x82   : > { %3418 = vmatprep.subr.bf16.mxu0 %v4458_v31  ;;  %v5325_v31 = vcombine.high %v5263_v47, %v5263_v47  ;;  %v417_v22 = vld [vmem:[%s5219_s3 + $0x628] sm:$0xff] }
  0x83   : > { %3581 = vmatpush1.bf16.xpose.msra.mxu1 %v4577_v30  ;;  %v4516_v30 = vcombine.high %v357_v24, %v361_v25  ;;  %v4563_v25 = vcombine.low %v405_v13, %v409_v14 }
  0x84   : > { %3582 = vmatprep.subr.bf16.mxu1 %v4586_v32  ;;  %v241_v32 = vld [vmem:[%s5219_s3 + $0xa8] sm:$0xff] }
  0x85   : > { %v4395_v46 = vcombine.low %v237_v39, %v241_v32 }
  0x89   : > { %3419 = vmatpush1.bf16.xpose.msra.mxu0 %v4457_v40  ;;  %v4396_v40 = vcombine.high %v237_v39, %v241_v32  ;;  %v421_v39 = vld [vmem:[%s5219_s3 + $0x648] sm:$0xff] }
  0x8a   : > { %3420 = vmatprep.subr.bf16.mxu0 %v4466_v42  ;;  %v245_v42 = vld [vmem:[%s5219_s3 + $0xc8] sm:$0xff] }
  0x8b   : > { %3583 = vmatpush1.bf16.xpose.msra.mxu1 %v4585_v41  ;;  %v4524_v41 = vcombine.high %v365_v33, %v369_v34  ;;  %v425_v32 = vld [vmem:[%s5219_s3 + $0x668] sm:$0xff]  ;;  %v4571_v34 = vcombine.low %v413_v21, %v417_v22 }
  0x8c   : > { %3584 = vmatprep.subr.bf16.mxu1 %v4594_v43  ;;  %v249_v43 = vld [vmem:[%s5219_s3 + $0xe8] sm:$0xff] }
  0x8d   : > { %v4403_v55 = vcombine.low %v245_v42, %v249_v43 }
  0x91   : > { %3421 = vmatpush1.bf16.xpose.msra.mxu0 %v4465_v49  ;;  %v4404_v49 = vcombine.high %v245_v42, %v249_v43  ;;  %v429_v42 = vld [vmem:[%s5219_s3 + $0x688] sm:$0xff] }
  0x92   : > { %3422 = vmatprep.subr.bf16.mxu0 %v4474_v51  ;;  %v253_v51 = vld [vmem:[%s5219_s3 + $0x108] sm:$0xff] }
  0x93   : > { %3585 = vmatpush1.bf16.xpose.msra.mxu1 %v4593_v50  ;;  %v4532_v50 = vcombine.high %v373_v44, %v377_v45  ;;  %v433_v43 = vld [vmem:[%s5219_s3 + $0x6a8] sm:$0xff]  ;;  %v4579_v45 = vcombine.low %v421_v39, %v425_v32 }
  0x94   : > { %3586 = vmatprep.subr.bf16.mxu1 %v4602_v52  ;;  %v257_v52 = vld [vmem:[%s5219_s3 + $0x128] sm:$0xff] }
  0x95   : > { %v4411_v63 = vcombine.low %v253_v51, %v257_v52 }
  0x99   : > { %3423 = vmatpush1.bf16.xpose.msra.mxu0 %v4473_v57  ;;  %v4412_v57 = vcombine.high %v253_v51, %v257_v52  ;;  %v437_v51 = vld [vmem:[%s5219_s3 + $0x6c8] sm:$0xff] }
  0x9a   : > { %3424 = vmatprep.subr.bf16.mxu0 %v4482_v59  ;;  %v261_v59 = vld [vmem:[%s5219_s3 + $0x148] sm:$0xff] }
  0x9b   : > { %3587 = vmatpush1.bf16.xpose.msra.mxu1 %v4601_v58  ;;  %v4540_v58 = vcombine.high %v381_v53, %v385_v54  ;;  %v441_v52 = vld [vmem:[%s5219_s3 + $0x6e8] sm:$0xff]  ;;  %v4587_v54 = vcombine.low %v429_v42, %v433_v43 }
  0x9c   : > { %3588 = vmatprep.subr.bf16.mxu1 %v4610_v60  ;;  %v265_v60 = vld [vmem:[%s5219_s3 + $0x168] sm:$0xff] }
  0x9d   : > { %v4419_v7 = vcombine.low %v261_v59, %v265_v60 }
  0xa1   : > { %3425 = vmatpush1.bf16.xpose.msra.mxu0 %v4481_v1  ;;  %v4420_v1 = vcombine.high %v261_v59, %v265_v60  ;;  %v445_v59 = vld [vmem:[%s5219_s3 + $0x708] sm:$0xff] }
  0xa2   : > { %3426 = vmatprep.subr.bf16.mxu0 %v4490_v3  ;;  %v269_v3 = vld [vmem:[%s5219_s3 + $0x188] sm:$0xff] }
  0xa3   : > { %3589 = vmatpush1.bf16.xpose.msra.mxu1 %v4609_v2  ;;  %v4548_v2 = vcombine.high %v389_v61, %v393_v62  ;;  %v449_v60 = vld [vmem:[%s5219_s3 + $0x728] sm:$0xff]  ;;  %v4595_v62 = vcombine.low %v437_v51, %v441_v52 }
  0xa4   : > { %3590 = vmatprep.subr.bf16.mxu1 %v4618_v4  ;;  %v273_v4 = vld [vmem:[%s5219_s3 + $0x1a8] sm:$0xff] }
  0xa5   : > { %v4427_v15 = vcombine.low %v269_v3, %v273_v4 }
  0xa9   : > { %3427 = vmatpush1.bf16.xpose.msra.mxu0 %v4489_v9  ;;  %v4428_v9 = vcombine.high %v269_v3, %v273_v4  ;;  %v453_v3 = vld [vmem:[%s5219_s3 + $0x748] sm:$0xff] }
  0xaa   : > { %3428 = vmatprep.subr.bf16.mxu0 %v4498_v11  ;;  %v277_v11 = vld [vmem:[%s5219_s3 + $0x1c8] sm:$0xff] }
  0xab   : > { %3591 = vmatpush1.bf16.xpose.msra.mxu1 %v4617_v10  ;;  %v4556_v10 = vcombine.high %v397_v5, %v401_v6  ;;  %v457_v4 = vld [vmem:[%s5219_s3 + $0x768] sm:$0xff]  ;;  %v4603_v6 = vcombine.low %v445_v59, %v449_v60 }
  0xac   : > { %3592 = vmatprep.subr.bf16.mxu1 %v4626_v12  ;;  %v281_v12 = vld [vmem:[%s5219_s3 + $0x1e8] sm:$0xff] }
  0xad   : > { %v4435_v24 = vcombine.low %v277_v11, %v281_v12 }
  0xb1   : > { %3429 = vmatpush1.bf16.xpose.msra.mxu0 %v4497_v17  ;;  %v4436_v17 = vcombine.high %v277_v11, %v281_v12  ;;  %v461_v11 = vld [vmem:[%s5219_s3 + $0x788] sm:$0xff] }
  0xb2   : > { %3439 = vmatprep.subr.bf16.mxu0 %v4380_v19  ;;  %v285_v19 = vld [vmem:[%s5219_s3 + $0x208] sm:$0xff] }
  0xb3   : > { %3593 = vmatpush1.bf16.xpose.msra.mxu1 %v4625_v18  ;;  %v4564_v18 = vcombine.high %v405_v13, %v409_v14  ;;  %v465_v12 = vld [vmem:[%s5219_s3 + $0x7a8] sm:$0xff]  ;;  %v4611_v14 = vcombine.low %v453_v3, %v457_v4 }
  0xb4   : > { %3603 = vmatprep.subr.bf16.mxu1 %v4508_v20  ;;  %v289_v20 = vld [vmem:[%s5219_s3 + $0x228] sm:$0xff] }
  0xb5   : > { %v4443_v33 = vcombine.low %v285_v19, %v289_v20 }
  0xb8   : > { %3431 = vmatmul.mubr.bf16.vlgmr.msra.gmra.mrb[0].mxu0 %v5319_v23 }
  0xb9   : > { %3440 = vmatpush1.bf16.xpose.msra.mxu0 %v4379_v26  ;;  %3471 = vmatprep.mubr.bf16.mxu0 %v5325_v31  ;;  %v4444_v26 = vcombine.high %v285_v19, %v289_v20  ;;  %v469_v19 = vld [vmem:[%s5219_s3 + $0x7c8] sm:$0xff] }
  0xba   : > { %3595 = vmatmul.mubr.bf16.vlgmr.msra.gmra.mrb[0].mxu1 %v5319_v23  ;;  %3441 = vmatprep.subr.bf16.mxu0 %v4388_v29  ;;  %v293_v29 = vld [vmem:[%s5219_s3 + $0x248] sm:$0xff] }
  0xbb   : > { %3604 = vmatpush1.bf16.xpose.msra.mxu1 %v4507_v27  ;;  %3635 = vmatprep.mubr.bf16.mxu1 %v5325_v31  ;;  %v4572_v27 = vcombine.high %v413_v21, %v417_v22  ;;  %v473_v20 = vld [vmem:[%s5219_s3 + $0x7e8] sm:$0xff]  ;;  %v4619_v22 = vcombine.low %v461_v11, %v465_v12 }
  0xbc   : > { %3605 = vmatprep.subr.bf16.mxu1 %v4516_v30  ;;  %v297_v30 = vld [vmem:[%s5219_s3 + $0x268] sm:$0xff] }
  0xbd   : > { %v4451_v44 = vcombine.low %v293_v29, %v297_v30 }
  0xc1   : > { %3442 = vmatpush1.bf16.xpose.msra.mxu0 %v4387_v37  ;;  %v4452_v37 = vcombine.high %v293_v29, %v297_v30  ;;  %v350_v29 = vld [vmem:[%s5219_s3 + $0x410] sm:$0xff] }
  0xc2   : > { %3443 = vmatprep.subr.bf16.mxu0 %v4396_v40  ;;  %v301_v40 = vld [vmem:[%s5219_s3 + $0x288] sm:$0xff]  ;;  %v354_v30 = vld [vmem:[%s5219_s3 + $0x430] sm:$0xff] }
  0xc3   : > { %3606 = vmatpush1.bf16.xpose.msra.mxu1 %v4515_v38  ;;  %v4580_v38 = vcombine.high %v421_v39, %v425_v32  ;;  %v4627_v32 = vcombine.low %v469_v19, %v473_v20 }
  0xc4   : > { %3607 = vmatprep.subr.bf16.mxu1 %v4524_v41  ;;  %v305_v41 = vld [vmem:[%s5219_s3 + $0x2a8] sm:$0xff] }
  0xc5   : > { %v4459_v53 = vcombine.low %v301_v40, %v305_v41 }
  0xc9   : > { %3444 = vmatpush1.bf16.xpose.msra.mxu0 %v4395_v46  ;;  %v4460_v46 = vcombine.high %v301_v40, %v305_v41  ;;  %v234_v40 = vld [vmem:[%s5219_s3 + $0x70] sm:$0xff] }
  0xca   : > { %3445 = vmatprep.subr.bf16.mxu0 %v4404_v49  ;;  %v309_v49 = vld [vmem:[%s5219_s3 + $0x2c8] sm:$0xff] }
  0xcb   : > { %3608 = vmatpush1.bf16.xpose.msra.mxu1 %v4523_v48  ;;  %v4588_v48 = vcombine.high %v429_v42, %v433_v43  ;;  %v5400_v42 = vcombine.high %v5319_v23, %v5319_v23  ;;  %v358_v43 = vld [vmem:[%s5219_s3 + $0x450] sm:$0xff] }
  0xcc   : > { %3609 = vmatprep.subr.bf16.mxu1 %v4532_v50  ;;  %v313_v50 = vld [vmem:[%s5219_s3 + $0x2e8] sm:$0xff] }
  0xcd   : > { %v4467_v61 = vcombine.low %v309_v49, %v313_v50 }
  0xd1   : > { %3446 = vmatpush1.bf16.xpose.msra.mxu0 %v4403_v55  ;;  %v4468_v55 = vcombine.high %v309_v49, %v313_v50 }
  0xd2   : > { %3447 = vmatprep.subr.bf16.mxu0 %v4412_v57  ;;  %v317_v57 = vld [vmem:[%s5219_s3 + $0x308] sm:$0xff] }
  0xd3   : > { %3610 = vmatpush1.bf16.xpose.msra.mxu1 %v4531_v56  ;;  %v4596_v56 = vcombine.high %v437_v51, %v441_v52  ;;  %v238_v51 = vld [vmem:[%s5219_s3 + $0x90] sm:$0xff] }
  0xd4   : > { %3611 = vmatprep.subr.bf16.mxu1 %v4540_v58  ;;  %v321_v58 = vld [vmem:[%s5219_s3 + $0x328] sm:$0xff]  ;;  %v242_v52 = vld [vmem:[%s5219_s3 + $0xb0] sm:$0xff] }
  0xd5   : > { %v4475_v5 = vcombine.low %v317_v57, %v321_v58 }
  0xd9   : > { %3448 = vmatpush1.bf16.xpose.msra.mxu0 %v4411_v63  ;;  %v4476_v63 = vcombine.high %v317_v57, %v321_v58  ;;  %v4398_v57 = vcombine.high %v238_v51, %v242_v52 }
  0xda   : > { %3449 = vmatprep.subr.bf16.mxu0 %v4420_v1  ;;  %v325_v1 = vld [vmem:[%s5219_s3 + $0x348] sm:$0xff] }
  0xdb   : > { %3612 = vmatpush1.bf16.xpose.msra.mxu1 %v4539_v0  ;;  %v4604_v0 = vcombine.high %v445_v59, %v449_v60  ;;  %v246_v59 = vld [vmem:[%s5219_s3 + $0xd0] sm:$0xff] }
  0xdc   : > { %3613 = vmatprep.subr.bf16.mxu1 %v4548_v2  ;;  %v329_v2 = vld [vmem:[%s5219_s3 + $0x368] sm:$0xff]  ;;  %v250_v60 = vld [vmem:[%s5219_s3 + $0xf0] sm:$0xff] }
  0xdd   : > { %v4483_v13 = vcombine.low %v325_v1, %v329_v2 }
  0xe1   : > { %3450 = vmatpush1.bf16.xpose.msra.mxu0 %v4419_v7  ;;  %v4484_v7 = vcombine.high %v325_v1, %v329_v2  ;;  %v4406_v1 = vcombine.high %v246_v59, %v250_v60 }
  0xe2   : > { %3451 = vmatprep.subr.bf16.mxu0 %v4428_v9  ;;  %v333_v9 = vld [vmem:[%s5219_s3 + $0x388] sm:$0xff] }
  0xe3   : > { %3614 = vmatpush1.bf16.xpose.msra.mxu1 %v4547_v8  ;;  %v4612_v8 = vcombine.high %v453_v3, %v457_v4  ;;  %v254_v3 = vld [vmem:[%s5219_s3 + $0x110] sm:$0xff] }
  0xe4   : > { %3615 = vmatprep.subr.bf16.mxu1 %v4556_v10  ;;  %v337_v10 = vld [vmem:[%s5219_s3 + $0x3a8] sm:$0xff]  ;;  %v258_v4 = vld [vmem:[%s5219_s3 + $0x130] sm:$0xff] }
  0xe5   : > { %v4491_v21 = vcombine.low %v333_v9, %v337_v10 }
  0xe9   : > { %3452 = vmatpush1.bf16.xpose.msra.mxu0 %v4427_v15  ;;  %v4492_v15 = vcombine.high %v333_v9, %v337_v10  ;;  %v4414_v9 = vcombine.high %v254_v3, %v258_v4 }
  0xea   : > { %3453 = vmatprep.subr.bf16.mxu0 %v4436_v17  ;;  %v341_v17 = vld [vmem:[%s5219_s3 + $0x3c8] sm:$0xff] }
  0xeb   : > { %3616 = vmatpush1.bf16.xpose.msra.mxu1 %v4555_v16  ;;  %v4620_v16 = vcombine.high %v461_v11, %v465_v12  ;;  %v262_v11 = vld [vmem:[%s5219_s3 + $0x150] sm:$0xff] }
  0xec   : > { %3617 = vmatprep.subr.bf16.mxu1 %v4564_v18  ;;  %v345_v18 = vld [vmem:[%s5219_s3 + $0x3e8] sm:$0xff]  ;;  %v266_v12 = vld [vmem:[%s5219_s3 + $0x170] sm:$0xff] }
  0xed   : > { %v4499_v39 = vcombine.low %v341_v17, %v345_v18 }
  0xf1   : > { %3454 = vmatpush1.bf16.xpose.msra.mxu0 %v4435_v24  ;;  %v4500_v24 = vcombine.high %v341_v17, %v345_v18  ;;  %v4422_v17 = vcombine.high %v262_v11, %v266_v12 }
  0xf2   : > { %3455 = vmatprep.subr.bf16.mxu0 %v4444_v26  ;;  %v222_v26 = vld [vmem:[%s5219_s3 + $0x10] sm:$0xff] }
  0xf3   : > { %3618 = vmatpush1.bf16.xpose.msra.mxu1 %v4563_v25  ;;  %v4628_v25 = vcombine.high %v469_v19, %v473_v20  ;;  %v270_v19 = vld [vmem:[%s5219_s3 + $0x190] sm:$0xff] }
  0xf4   : > { %3619 = vmatprep.subr.bf16.mxu1 %v4572_v27  ;;  %v226_v27 = vld [vmem:[%s5219_s3 + $0x30] sm:$0xff] }
  0xf5   : > { %v274_v20 = vld [vmem:[%s5219_s3 + $0x1b0] sm:$0xff] }
  0xf9   : > { %3456 = vmatpush1.bf16.xpose.msra.mxu0 %v4443_v33  ;;  %v4382_v33 = vcombine.high %v222_v26, %v226_v27 }
  0xfa   : > { %3457 = vmatprep.subr.bf16.mxu0 %v4452_v37  ;;  %v741_v37 = vcombine.high %v5250_v36, %v5250_v36 }
  0xfb   : > { %3620 = vmatpush1.bf16.xpose.msra.mxu1 %v4571_v34  ;;  %v4510_v34 = vcombine.high %v350_v29, %v354_v30 }
  0xfc   : > { %3621 = vmatprep.subr.bf16.mxu1 %v4580_v38  ;;  %v230_v38 = vld [vmem:[%s5219_s3 + $0x50] sm:$0xff]  ;;  %v5396_v41 = vrot.slane %v741_v37, %v5248_v35 }
  0xfe   : > { %v757_v36 = vcombine.high %v5396_v41, %v5396_v41 }
 0x100   : > { %v5407_v50 = vrot.slane %v757_v36, %v5248_v35 }
 0x101   : > { %3458 = vmatpush1.bf16.xpose.msra.mxu0 %v4451_v44  ;;  %v362_v44 = vld [vmem:[%s5219_s3 + $0x470] sm:$0xff] }
 0x102   : > { %3459 = vmatprep.subr.bf16.mxu0 %v4460_v46  ;;  %v4509_v46 = vcombine.low %v350_v29, %v354_v30  ;;  %v4518_v49 = vcombine.high %v358_v43, %v362_v44  ;;  %v278_v29 = vld [vmem:[%s5219_s3 + $0x1d0] sm:$0xff] }
 0x103   : > { %3622 = vmatpush1.bf16.xpose.msra.mxu1 %v4579_v45  ;;  %v4381_v45 = vcombine.low %v222_v26, %v226_v27  ;;  %v4430_v26 = vcombine.high %v270_v19, %v274_v20  ;;  %v282_v30 = vld [vmem:[%s5219_s3 + $0x1f0] sm:$0xff] }
 0x104   : > { %3623 = vmatprep.subr.bf16.mxu1 %v4588_v48  ;;  %v4390_v48 = vcombine.high %v230_v38, %v234_v40  ;;  %v4438_v37 = vcombine.high %v278_v29, %v282_v30  ;;  %v4437_v36 = vcombine.low %v278_v29, %v282_v30  ;;  %v334_v29 = vld [vmem:[%s5219_s3 + $0x390] sm:$0xff] }
 0x105   : > { %v338_v30 = vld [vmem:[%s5219_s3 + $0x3b0] sm:$0xff] }
 0x109   : > { %3460 = vmatpush1.bf16.xpose.msra.mxu0 %v4459_v53  ;;  %v366_v53 = vld [vmem:[%s5219_s3 + $0x490] sm:$0xff] }
 0x10a   : > { %3461 = vmatprep.subr.bf16.mxu0 %v4468_v55  ;;  %v4389_v55 = vcombine.low %v230_v38, %v234_v40  ;;  %v286_v40 = vld [vmem:[%s5219_s3 + $0x210] sm:$0xff] }
 0x10b   : > { %3624 = vmatpush1.bf16.xpose.msra.mxu1 %v4587_v54  ;;  %v370_v54 = vld [vmem:[%s5219_s3 + $0x4b0] sm:$0xff] }
 0x10c   : > { %3625 = vmatprep.subr.bf16.mxu1 %v4596_v56  ;;  %v4517_v56 = vcombine.low %v358_v43, %v362_v44  ;;  %v4526_v58 = vcombine.high %v366_v53, %v370_v54  ;;  %v290_v43 = vld [vmem:[%s5219_s3 + $0x230] sm:$0xff] }
 0x10d   : > { %v414_v44 = vld [vmem:[%s5219_s3 + $0x610] sm:$0xff] }
 0x111   : > { %3462 = vmatpush1.bf16.xpose.msra.mxu0 %v4467_v61  ;;  %v374_v61 = vld [vmem:[%s5219_s3 + $0x4d0] sm:$0xff] }
 0x112   : > { %3463 = vmatprep.subr.bf16.mxu0 %v4476_v63  ;;  %v4397_v63 = vcombine.low %v238_v51, %v242_v52  ;;  %v294_v51 = vld [vmem:[%s5219_s3 + $0x250] sm:$0xff] }
 0x113   : > { %3626 = vmatpush1.bf16.xpose.msra.mxu1 %v4595_v62  ;;  %v378_v62 = vld [vmem:[%s5219_s3 + $0x4f0] sm:$0xff] }
 0x114   : > { %3627 = vmatprep.subr.bf16.mxu1 %v4604_v0  ;;  %v4525_v0 = vcombine.low %v366_v53, %v370_v54  ;;  %v4534_v2 = vcombine.high %v374_v61, %v378_v62  ;;  %v298_v52 = vld [vmem:[%s5219_s3 + $0x270] sm:$0xff] }
 0x115   : > { %v422_v53 = vld [vmem:[%s5219_s3 + $0x650] sm:$0xff] }
 0x116   : > { %v426_v54 = vld [vmem:[%s5219_s3 + $0x670] sm:$0xff] }
 0x119   : > { %3464 = vmatpush1.bf16.xpose.msra.mxu0 %v4475_v5  ;;  %v382_v5 = vld [vmem:[%s5219_s3 + $0x510] sm:$0xff] }
 0x11a   : > { %3465 = vmatprep.subr.bf16.mxu0 %v4484_v7  ;;  %v4405_v7 = vcombine.low %v246_v59, %v250_v60  ;;  %v302_v59 = vld [vmem:[%s5219_s3 + $0x290] sm:$0xff] }
 0x11b   : > { %3628 = vmatpush1.bf16.xpose.msra.mxu1 %v4603_v6  ;;  %v386_v6 = vld [vmem:[%s5219_s3 + $0x530] sm:$0xff] }
 0x11c   : > { %3629 = vmatprep.subr.bf16.mxu1 %v4612_v8  ;;  %v4533_v8 = vcombine.low %v374_v61, %v378_v62  ;;  %v4542_v10 = vcombine.high %v382_v5, %v386_v6  ;;  %v306_v60 = vld [vmem:[%s5219_s3 + $0x2b0] sm:$0xff] }
 0x11d   : > { %v430_v61 = vld [vmem:[%s5219_s3 + $0x690] sm:$0xff] }
 0x11e   : > { %v434_v62 = vld [vmem:[%s5219_s3 + $0x6b0] sm:$0xff] }
 0x121   : > { %3466 = vmatpush1.bf16.xpose.msra.mxu0 %v4483_v13  ;;  %v390_v13 = vld [vmem:[%s5219_s3 + $0x550] sm:$0xff] }
 0x122   : > { %3467 = vmatprep.subr.bf16.mxu0 %v4492_v15  ;;  %v4413_v15 = vcombine.low %v254_v3, %v258_v4  ;;  %v310_v3 = vld [vmem:[%s5219_s3 + $0x2d0] sm:$0xff] }
 0x123   : > { %3630 = vmatpush1.bf16.xpose.msra.mxu1 %v4611_v14  ;;  %v394_v14 = vld [vmem:[%s5219_s3 + $0x570] sm:$0xff] }
 0x124   : > { %3631 = vmatprep.subr.bf16.mxu1 %v4620_v16  ;;  %v4541_v16 = vcombine.low %v382_v5, %v386_v6  ;;  %v4550_v18 = vcombine.high %v390_v13, %v394_v14  ;;  %v314_v4 = vld [vmem:[%s5219_s3 + $0x2f0] sm:$0xff] }
 0x125   : > { %v438_v5 = vld [vmem:[%s5219_s3 + $0x6d0] sm:$0xff] }
 0x126   : > { %v442_v6 = vld [vmem:[%s5219_s3 + $0x6f0] sm:$0xff] }
 0x129   : > { %3468 = vmatpush1.bf16.xpose.msra.mxu0 %v4491_v21  ;;  %v398_v21 = vld [vmem:[%s5219_s3 + $0x590] sm:$0xff] }
 0x12a   : > { %3469 = vmatprep.subr.bf16.mxu0 %v4500_v24  ;;  %v4421_v24 = vcombine.low %v262_v11, %v266_v12  ;;  %v318_v11 = vld [vmem:[%s5219_s3 + $0x310] sm:$0xff] }
 0x12b   : > { %3632 = vmatpush1.bf16.xpose.msra.mxu1 %v4619_v22  ;;  %v402_v22 = vld [vmem:[%s5219_s3 + $0x5b0] sm:$0xff] }
 0x12c   : > { %3633 = vmatprep.subr.bf16.mxu1 %v4628_v25  ;;  %v4549_v25 = vcombine.low %v390_v13, %v394_v14  ;;  %v4558_v27 = vcombine.high %v398_v21, %v402_v22  ;;  %v322_v12 = vld [vmem:[%s5219_s3 + $0x330] sm:$0xff] }
 0x12d   : > { %v446_v13 = vld [vmem:[%s5219_s3 + $0x710] sm:$0xff] }
 0x12e   : > { %v450_v14 = vld [vmem:[%s5219_s3 + $0x730] sm:$0xff] }
 0x131   : > { %3470 = vmatpush1.bf16.xpose.msra.mxu0 %v4499_v39  ;;  %v406_v39 = vld [vmem:[%s5219_s3 + $0x5d0] sm:$0xff] }
 0x132   : > { %3480 = vmatprep.subr.bf16.mxu0 %v4382_v33  ;;  %v4429_v33 = vcombine.low %v270_v19, %v274_v20  ;;  %v326_v19 = vld [vmem:[%s5219_s3 + $0x350] sm:$0xff] }
 0x133   : > { %3634 = vmatpush1.bf16.xpose.msra.mxu1 %v4627_v32  ;;  %v410_v32 = vld [vmem:[%s5219_s3 + $0x5f0] sm:$0xff] }
 0x134   : > { %3644 = vmatprep.subr.bf16.mxu1 %v4510_v34  ;;  %v4557_v34 = vcombine.low %v398_v21, %v402_v22  ;;  %v4566_v38 = vcombine.high %v406_v39, %v410_v32  ;;  %v330_v20 = vld [vmem:[%s5219_s3 + $0x370] sm:$0xff] }
 0x135   : > { %v454_v21 = vld [vmem:[%s5219_s3 + $0x750] sm:$0xff] }
 0x136   : > { %v458_v22 = vld [vmem:[%s5219_s3 + $0x770] sm:$0xff] }
 0x138   : > { %3472 = vmatmul.mubr.bf16.vlgmr.msra.gmra.mrb[0].mxu0 %v5400_v42 }
 0x139   : > { %3481 = vmatpush1.bf16.xpose.msra.mxu0 %v4381_v45  ;;  %3512 = vmatprep.mubr.bf16.mxu0 %v5407_v50  ;;  %v418_v45 = vld [vmem:[%s5219_s3 + $0x630] sm:$0xff] }
 0x13a   : > { %3636 = vmatmul.mubr.bf16.vlgmr.msra.gmra.mrb[0].mxu1 %v5400_v42  ;;  %3482 = vmatprep.subr.bf16.mxu0 %v4390_v48  ;;  %v4446_v48 = vcombine.high %v286_v40, %v290_v43 }
 0x13b   : > { %3645 = vmatpush1.bf16.xpose.msra.mxu1 %v4509_v46  ;;  %3676 = vmatprep.mubr.bf16.mxu1 %v5407_v50  ;;  %v4565_v46 = vcombine.low %v406_v39, %v410_v32  ;;  %v462_v39 = vld [vmem:[%s5219_s3 + $0x790] sm:$0xff] }
 0x13c   : > { %3646 = vmatprep.subr.bf16.mxu1 %v4518_v49  ;;  %v4574_v49 = vcombine.high %v414_v44, %v418_v45  ;;  %v466_v32 = vld [vmem:[%s5219_s3 + $0x7b0] sm:$0xff] }
 0x141   : > { %3483 = vmatpush1.bf16.xpose.msra.mxu0 %v4389_v55  ;;  %v4445_v55 = vcombine.low %v286_v40, %v290_v43  ;;  %v342_v40 = vld [vmem:[%s5219_s3 + $0x3d0] sm:$0xff] }
 0x142   : > { %3484 = vmatprep.subr.bf16.mxu0 %v4398_v57  ;;  %v4454_v57 = vcombine.high %v294_v51, %v298_v52  ;;  %v346_v43 = vld [vmem:[%s5219_s3 + $0x3f0] sm:$0xff] }
 0x143   : > { %3647 = vmatpush1.bf16.xpose.msra.mxu1 %v4517_v56  ;;  %v4573_v56 = vcombine.low %v414_v44, %v418_v45  ;;  %v470_v44 = vld [vmem:[%s5219_s3 + $0x7d0] sm:$0xff] }
 0x144   : > { %3648 = vmatprep.subr.bf16.mxu1 %v4526_v58  ;;  %v4582_v58 = vcombine.high %v422_v53, %v426_v54  ;;  %v474_v45 = vld [vmem:[%s5219_s3 + $0x7f0] sm:$0xff] }
 0x149   : > { %3485 = vmatpush1.bf16.xpose.msra.mxu0 %v4397_v63  ;;  %v4453_v63 = vcombine.low %v294_v51, %v298_v52  ;;  %v223_v51 = vld [vmem:[%s5219_s3 + $0x18] sm:$0xff] }
 0x14a   : > { %3486 = vmatprep.subr.bf16.mxu0 %v4406_v1  ;;  %v4462_v1 = vcombine.high %v302_v59, %v306_v60  ;;  %v227_v52 = vld [vmem:[%s5219_s3 + $0x38] sm:$0xff] }
 0x14b   : > { %3649 = vmatpush1.bf16.xpose.msra.mxu1 %v4525_v0  ;;  %v4581_v0 = vcombine.low %v422_v53, %v426_v54  ;;  %v351_v53 = vld [vmem:[%s5219_s3 + $0x418] sm:$0xff] }
 0x14c   : > { %3650 = vmatprep.subr.bf16.mxu1 %v4534_v2  ;;  %v4590_v2 = vcombine.high %v430_v61, %v434_v62  ;;  %v355_v54 = vld [vmem:[%s5219_s3 + $0x438] sm:$0xff] }
 0x151   : > { %3487 = vmatpush1.bf16.xpose.msra.mxu0 %v4405_v7  ;;  %v4461_v7 = vcombine.low %v302_v59, %v306_v60  ;;  %v231_v59 = vld [vmem:[%s5219_s3 + $0x58] sm:$0xff] }
 0x152   : > { %3488 = vmatprep.subr.bf16.mxu0 %v4414_v9  ;;  %v4470_v9 = vcombine.high %v310_v3, %v314_v4  ;;  %v235_v60 = vld [vmem:[%s5219_s3 + $0x78] sm:$0xff] }
 0x153   : > { %3651 = vmatpush1.bf16.xpose.msra.mxu1 %v4533_v8  ;;  %v4589_v8 = vcombine.low %v430_v61, %v434_v62  ;;  %v5477_v61 = vrot.slane %v5396_v41, %v5248_v35  ;;  %v359_v62 = vld [vmem:[%s5219_s3 + $0x458] sm:$0xff] }
 0x154   : > { %3652 = vmatprep.subr.bf16.mxu1 %v4542_v10  ;;  %v4598_v10 = vcombine.high %v438_v5, %v442_v6  ;;  %v239_v35 = vld [vmem:[%s5219_s3 + $0x98] sm:$0xff] }
 0x155   : > { %v243_v41 = vld [vmem:[%s5219_s3 + $0xb8] sm:$0xff] }
 0x159   : > { %3489 = vmatpush1.bf16.xpose.msra.mxu0 %v4413_v15  ;;  %v4469_v15 = vcombine.low %v310_v3, %v314_v4  ;;  %v5483_v4 = vcombine.high %v5407_v50, %v5407_v50 }
 0x15a   : > { %3490 = vmatprep.subr.bf16.mxu0 %v4422_v17  ;;  %v4478_v17 = vcombine.high %v318_v11, %v322_v12 }
 0x15b   : > { %3653 = vmatpush1.bf16.xpose.msra.mxu1 %v4541_v16  ;;  %v4597_v16 = vcombine.low %v438_v5, %v442_v6  ;;  %v367_v5 = vld [vmem:[%s5219_s3 + $0x498] sm:$0xff] }
 0x15c   : > { %3654 = vmatprep.subr.bf16.mxu1 %v4550_v18  ;;  %v4606_v18 = vcombine.high %v446_v13, %v450_v14  ;;  %v371_v6 = vld [vmem:[%s5219_s3 + $0x4b8] sm:$0xff] }
 0x161   : > { %3491 = vmatpush1.bf16.xpose.msra.mxu0 %v4421_v24  ;;  %v4477_v24 = vcombine.low %v318_v11, %v322_v12  ;;  %v247_v11 = vld [vmem:[%s5219_s3 + $0xd8] sm:$0xff] }
 0x162   : > { %3492 = vmatprep.subr.bf16.mxu0 %v4430_v26  ;;  %v4486_v26 = vcombine.high %v326_v19, %v330_v20  ;;  %v251_v12 = vld [vmem:[%s5219_s3 + $0xf8] sm:$0xff] }
 0x163   : > { %3655 = vmatpush1.bf16.xpose.msra.mxu1 %v4549_v25  ;;  %v4605_v25 = vcombine.low %v446_v13, %v450_v14  ;;  %v375_v13 = vld [vmem:[%s5219_s3 + $0x4d8] sm:$0xff] }
 0x164   : > { %3656 = vmatprep.subr.bf16.mxu1 %v4558_v27  ;;  %v4614_v27 = vcombine.high %v454_v21, %v458_v22  ;;  %v379_v14 = vld [vmem:[%s5219_s3 + $0x4f8] sm:$0xff] }
 0x169   : > { %3493 = vmatpush1.bf16.xpose.msra.mxu0 %v4429_v33  ;;  %v4485_v33 = vcombine.low %v326_v19, %v330_v20  ;;  %v255_v19 = vld [vmem:[%s5219_s3 + $0x118] sm:$0xff] }
 0x16a   : > { %3494 = vmatprep.subr.bf16.mxu0 %v4438_v37  ;;  %v4494_v37 = vcombine.high %v334_v29, %v338_v30  ;;  %v259_v20 = vld [vmem:[%s5219_s3 + $0x138] sm:$0xff] }
 0x16b   : > { %3657 = vmatpush1.bf16.xpose.msra.mxu1 %v4557_v34  ;;  %v4613_v34 = vcombine.low %v454_v21, %v458_v22  ;;  %v383_v21 = vld [vmem:[%s5219_s3 + $0x518] sm:$0xff] }
 0x16c   : > { %3658 = vmatprep.subr.bf16.mxu1 %v4566_v38  ;;  %v4622_v38 = vcombine.high %v462_v39, %v466_v32  ;;  %v387_v22 = vld [vmem:[%s5219_s3 + $0x538] sm:$0xff] }
 0x171   : > { %3495 = vmatpush1.bf16.xpose.msra.mxu0 %v4437_v36  ;;  %v4493_v36 = vcombine.low %v334_v29, %v338_v30  ;;  %v263_v29 = vld [vmem:[%s5219_s3 + $0x158] sm:$0xff] }
 0x172   : > { %3496 = vmatprep.subr.bf16.mxu0 %v4446_v48  ;;  %v4502_v48 = vcombine.high %v342_v40, %v346_v43  ;;  %v267_v30 = vld [vmem:[%s5219_s3 + $0x178] sm:$0xff] }
 0x173   : > { %3659 = vmatpush1.bf16.xpose.msra.mxu1 %v4565_v46  ;;  %v4621_v46 = vcombine.low %v462_v39, %v466_v32  ;;  %v391_v39 = vld [vmem:[%s5219_s3 + $0x558] sm:$0xff] }
 0x174   : > { %3660 = vmatprep.subr.bf16.mxu1 %v4574_v49  ;;  %v4630_v49 = vcombine.high %v470_v44, %v474_v45  ;;  %v395_v32 = vld [vmem:[%s5219_s3 + $0x578] sm:$0xff] }
 0x179   : > { %3497 = vmatpush1.bf16.xpose.msra.mxu0 %v4445_v55  ;;  %v4501_v55 = vcombine.low %v342_v40, %v346_v43  ;;  %v271_v40 = vld [vmem:[%s5219_s3 + $0x198] sm:$0xff] }
 0x17a   : > { %3498 = vmatprep.subr.bf16.mxu0 %v4454_v57  ;;  %v4384_v57 = vcombine.high %v223_v51, %v227_v52  ;;  %v275_v43 = vld [vmem:[%s5219_s3 + $0x1b8] sm:$0xff] }
 0x17b   : > { %3661 = vmatpush1.bf16.xpose.msra.mxu1 %v4573_v56  ;;  %v4629_v56 = vcombine.low %v470_v44, %v474_v45  ;;  %v399_v44 = vld [vmem:[%s5219_s3 + $0x598] sm:$0xff] }
 0x17c   : > { %3662 = vmatprep.subr.bf16.mxu1 %v4582_v58  ;;  %v4512_v58 = vcombine.high %v351_v53, %v355_v54  ;;  %v403_v45 = vld [vmem:[%s5219_s3 + $0x5b8] sm:$0xff] }
 0x181   : > { %3499 = vmatpush1.bf16.xpose.msra.mxu0 %v4453_v63  ;;  %v363_v63 = vld [vmem:[%s5219_s3 + $0x478] sm:$0xff] }
 0x182   : > { %3500 = vmatprep.subr.bf16.mxu0 %v4462_v1  ;;  %v4511_v1 = vcombine.low %v351_v53, %v355_v54  ;;  %v4520_v3 = vcombine.high %v359_v62, %v363_v63  ;;  %v407_v53 = vld [vmem:[%s5219_s3 + $0x5d8] sm:$0xff] }
 0x183   : > { %3663 = vmatpush1.bf16.xpose.msra.mxu1 %v4581_v0  ;;  %v4383_v0 = vcombine.low %v223_v51, %v227_v52  ;;  %v279_v51 = vld [vmem:[%s5219_s3 + $0x1d8] sm:$0xff] }
 0x184   : > { %3664 = vmatprep.subr.bf16.mxu1 %v4590_v2  ;;  %v4392_v2 = vcombine.high %v231_v59, %v235_v60  ;;  %v283_v52 = vld [vmem:[%s5219_s3 + $0x1f8] sm:$0xff] }
 0x185   : > { %v411_v54 = vld [vmem:[%s5219_s3 + $0x5f8] sm:$0xff] }
 0x189   : > { %3501 = vmatpush1.bf16.xpose.msra.mxu0 %v4461_v7  ;;  %v4391_v7 = vcombine.low %v231_v59, %v235_v60  ;;  %v287_v59 = vld [vmem:[%s5219_s3 + $0x218] sm:$0xff] }
 0x18a   : > { %3502 = vmatprep.subr.bf16.mxu0 %v4470_v9  ;;  %v4400_v9 = vcombine.high %v239_v35, %v243_v41  ;;  %v291_v60 = vld [vmem:[%s5219_s3 + $0x238] sm:$0xff] }
 0x18b   : > { %3665 = vmatpush1.bf16.xpose.msra.mxu1 %v4589_v8  ;;  %v4519_v8 = vcombine.low %v359_v62, %v363_v63  ;;  %v415_v62 = vld [vmem:[%s5219_s3 + $0x618] sm:$0xff] }
 0x18c   : > { %3666 = vmatprep.subr.bf16.mxu1 %v4598_v10  ;;  %v4528_v10 = vcombine.high %v367_v5, %v371_v6  ;;  %v419_v63 = vld [vmem:[%s5219_s3 + $0x638] sm:$0xff] }
 0x191   : > { %3503 = vmatpush1.bf16.xpose.msra.mxu0 %v4469_v15  ;;  %v4399_v15 = vcombine.low %v239_v35, %v243_v41  ;;  %v295_v35 = vld [vmem:[%s5219_s3 + $0x258] sm:$0xff] }
 0x192   : > { %3504 = vmatprep.subr.bf16.mxu0 %v4478_v17  ;;  %v4408_v17 = vcombine.high %v247_v11, %v251_v12  ;;  %v299_v41 = vld [vmem:[%s5219_s3 + $0x278] sm:$0xff] }
 0x193   : > { %3667 = vmatpush1.bf16.xpose.msra.mxu1 %v4597_v16  ;;  %v4527_v16 = vcombine.low %v367_v5, %v371_v6  ;;  %v423_v5 = vld [vmem:[%s5219_s3 + $0x658] sm:$0xff] }
 0x194   : > { %3668 = vmatprep.subr.bf16.mxu1 %v4606_v18  ;;  %v4536_v18 = vcombine.high %v375_v13, %v379_v14  ;;  %v427_v6 = vld [vmem:[%s5219_s3 + $0x678] sm:$0xff] }
 0x199   : > { %3505 = vmatpush1.bf16.xpose.msra.mxu0 %v4477_v24  ;;  %v4407_v24 = vcombine.low %v247_v11, %v251_v12  ;;  %v303_v11 = vld [vmem:[%s5219_s3 + $0x298] sm:$0xff] }
 0x19a   : > { %3506 = vmatprep.subr.bf16.mxu0 %v4486_v26  ;;  %v4416_v26 = vcombine.high %v255_v19, %v259_v20  ;;  %v307_v12 = vld [vmem:[%s5219_s3 + $0x2b8] sm:$0xff] }
 0x19b   : > { %3669 = vmatpush1.bf16.xpose.msra.mxu1 %v4605_v25  ;;  %v4535_v25 = vcombine.low %v375_v13, %v379_v14  ;;  %v431_v13 = vld [vmem:[%s5219_s3 + $0x698] sm:$0xff] }
 0x19c   : > { %3670 = vmatprep.subr.bf16.mxu1 %v4614_v27  ;;  %v4544_v27 = vcombine.high %v383_v21, %v387_v22  ;;  %v435_v14 = vld [vmem:[%s5219_s3 + $0x6b8] sm:$0xff] }
 0x1a1   : > { %3507 = vmatpush1.bf16.xpose.msra.mxu0 %v4485_v33  ;;  %v4415_v33 = vcombine.low %v255_v19, %v259_v20  ;;  %v311_v19 = vld [vmem:[%s5219_s3 + $0x2d8] sm:$0xff] }
 0x1a2   : > { %3508 = vmatprep.subr.bf16.mxu0 %v4494_v37  ;;  %v4424_v37 = vcombine.high %v263_v29, %v267_v30  ;;  %v315_v20 = vld [vmem:[%s5219_s3 + $0x2f8] sm:$0xff] }
 0x1a3   : > { %3671 = vmatpush1.bf16.xpose.msra.mxu1 %v4613_v34  ;;  %v4543_v34 = vcombine.low %v383_v21, %v387_v22  ;;  %v439_v21 = vld [vmem:[%s5219_s3 + $0x6d8] sm:$0xff] }
 0x1a4   : > { %3672 = vmatprep.subr.bf16.mxu1 %v4622_v38  ;;  %v4552_v38 = vcombine.high %v391_v39, %v395_v32  ;;  %v443_v22 = vld [vmem:[%s5219_s3 + $0x6f8] sm:$0xff] }
 0x1a9   : > { %3509 = vmatpush1.bf16.xpose.msra.mxu0 %v4493_v36  ;;  %v4423_v36 = vcombine.low %v263_v29, %v267_v30  ;;  %v319_v29 = vld [vmem:[%s5219_s3 + $0x318] sm:$0xff] }
 0x1aa   : > { %3510 = vmatprep.subr.bf16.mxu0 %v4502_v48  ;;  %v4432_v48 = vcombine.high %v271_v40, %v275_v43  ;;  %v323_v30 = vld [vmem:[%s5219_s3 + $0x338] sm:$0xff] }
 0x1ab   : > { %3673 = vmatpush1.bf16.xpose.msra.mxu1 %v4621_v46  ;;  %v4551_v46 = vcombine.low %v391_v39, %v395_v32  ;;  %v447_v39 = vld [vmem:[%s5219_s3 + $0x718] sm:$0xff] }
 0x1ac   : > { %3674 = vmatprep.subr.bf16.mxu1 %v4630_v49  ;;  %v4560_v49 = vcombine.high %v399_v44, %v403_v45  ;;  %v451_v32 = vld [vmem:[%s5219_s3 + $0x738] sm:$0xff] }
 0x1b1   : > { %3511 = vmatpush1.bf16.xpose.msra.mxu0 %v4501_v55  ;;  %v4431_v55 = vcombine.low %v271_v40, %v275_v43  ;;  %v327_v40 = vld [vmem:[%s5219_s3 + $0x358] sm:$0xff] }
 0x1b2   : > { %3521 = vmatprep.subr.bf16.mxu0 %v4384_v57  ;;  %v4440_v57 = vcombine.high %v279_v51, %v283_v52  ;;  %v331_v43 = vld [vmem:[%s5219_s3 + $0x378] sm:$0xff] }
 0x1b3   : > { %3675 = vmatpush1.bf16.xpose.msra.mxu1 %v4629_v56  ;;  %v4559_v56 = vcombine.low %v399_v44, %v403_v45  ;;  %v455_v44 = vld [vmem:[%s5219_s3 + $0x758] sm:$0xff] }
 0x1b4   : > { %3685 = vmatprep.subr.bf16.mxu1 %v4512_v58  ;;  %v4568_v58 = vcombine.high %v407_v53, %v411_v54  ;;  %v459_v45 = vld [vmem:[%s5219_s3 + $0x778] sm:$0xff] }
 0x1b8   : > { %3513 = vmatmul.mubr.bf16.vlgmr.msra.gmra.mrb[0].mxu0 %v5477_v61 }
 0x1b9   : > { %3522 = vmatpush1.bf16.xpose.msra.mxu0 %v4383_v0  ;;  %3553 = vmatprep.mubr.bf16.mxu0 %v5483_v4  ;;  %v4439_v0 = vcombine.low %v279_v51, %v283_v52  ;;  %v335_v51 = vld [vmem:[%s5219_s3 + $0x398] sm:$0xff] }
 0x1ba   : > { %3677 = vmatmul.mubr.bf16.vlgmr.msra.gmra.mrb[0].mxu1 %v5477_v61  ;;  %3523 = vmatprep.subr.bf16.mxu0 %v4392_v2  ;;  %v4448_v2 = vcombine.high %v287_v59, %v291_v60  ;;  %v339_v52 = vld [vmem:[%s5219_s3 + $0x3b8] sm:$0xff] }
 0x1bb   : > { %3686 = vmatpush1.bf16.xpose.msra.mxu1 %v4511_v1  ;;  %3717 = vmatprep.mubr.bf16.mxu1 %v5483_v4  ;;  %v4567_v1 = vcombine.low %v407_v53, %v411_v54  ;;  %v463_v53 = vld [vmem:[%s5219_s3 + $0x798] sm:$0xff] }
 0x1bc   : > { %3687 = vmatprep.subr.bf16.mxu1 %v4520_v3  ;;  %v4576_v3 = vcombine.high %v415_v62, %v419_v63  ;;  %v467_v54 = vld [vmem:[%s5219_s3 + $0x7b8] sm:$0xff] }
 0x1c1   : > { %3524 = vmatpush1.bf16.xpose.msra.mxu0 %v4391_v7  ;;  %v4447_v7 = vcombine.low %v287_v59, %v291_v60  ;;  %v343_v59 = vld [vmem:[%s5219_s3 + $0x3d8] sm:$0xff] }
 0x1c2   : > { %3525 = vmatprep.subr.bf16.mxu0 %v4400_v9  ;;  %v4456_v9 = vcombine.high %v295_v35, %v299_v41  ;;  %v347_v60 = vld [vmem:[%s5219_s3 + $0x3f8] sm:$0xff] }
 0x1c3   : > { %3688 = vmatpush1.bf16.xpose.msra.mxu1 %v4519_v8  ;;  %v4575_v8 = vcombine.low %v415_v62, %v419_v63  ;;  %v471_v62 = vld [vmem:[%s5219_s3 + $0x7d8] sm:$0xff] }
 0x1c4   : > { %3689 = vmatprep.subr.bf16.mxu1 %v4528_v10  ;;  %v4584_v10 = vcombine.high %v423_v5, %v427_v6  ;;  %v475_v63 = vld [vmem:[%s5219_s3 + $0x7f8] sm:$0xff] }
 0x1c9   : > { %3526 = vmatpush1.bf16.xpose.msra.mxu0 %v4399_v15  ;;  %v4455_v15 = vcombine.low %v295_v35, %v299_v41  ;;  %v476_v35 = vld [vmem:[%s5219_s3 + $0x800] sm:$0xff] }
 0x1ca   : > { %3527 = vmatprep.subr.bf16.mxu0 %v4408_v17  ;;  %v4464_v17 = vcombine.high %v303_v11, %v307_v12  ;;  %v480_v41 = vld [vmem:[%s5219_s3 + $0x820] sm:$0xff] }
 0x1cb   : > { %3690 = vmatpush1.bf16.xpose.msra.mxu1 %v4527_v16  ;;  %v4583_v16 = vcombine.low %v423_v5, %v427_v6  ;;  %v604_v5 = vld [vmem:[%s5219_s3 + $0xc00] sm:$0xff] }
 0x1cc   : > { %3691 = vmatprep.subr.bf16.mxu1 %v4536_v18  ;;  %v4592_v18 = vcombine.high %v431_v13, %v435_v14  ;;  %v608_v6 = vld [vmem:[%s5219_s3 + $0xc20] sm:$0xff] }
 0x1d1   : > { %3528 = vmatpush1.bf16.xpose.msra.mxu0 %v4407_v24  ;;  %v4463_v24 = vcombine.low %v303_v11, %v307_v12  ;;  %v484_v11 = vld [vmem:[%s5219_s3 + $0x840] sm:$0xff] }
 0x1d2   : > { %3529 = vmatprep.subr.bf16.mxu0 %v4416_v26  ;;  %v4472_v26 = vcombine.high %v311_v19, %v315_v20  ;;  %v488_v12 = vld [vmem:[%s5219_s3 + $0x860] sm:$0xff] }
 0x1d3   : > { %3692 = vmatpush1.bf16.xpose.msra.mxu1 %v4535_v25  ;;  %v4591_v25 = vcombine.low %v431_v13, %v435_v14  ;;  %v5553_v13 = vcombine.high %v5477_v61, %v5477_v61  ;;  %v612_v14 = vld [vmem:[%s5219_s3 + $0xc40] sm:$0xff] }
 0x1d4   : > { %3693 = vmatprep.subr.bf16.mxu1 %v4544_v27  ;;  %v4600_v27 = vcombine.high %v439_v21, %v443_v22 }
 0x1d9   : > { %3530 = vmatpush1.bf16.xpose.msra.mxu0 %v4415_v33  ;;  %v4471_v33 = vcombine.low %v311_v19, %v315_v20  ;;  %v492_v20 = vld [vmem:[%s5219_s3 + $0x880] sm:$0xff] }
 0x1da   : > { %3531 = vmatprep.subr.bf16.mxu0 %v4424_v37  ;;  %v4480_v37 = vcombine.high %v319_v29, %v323_v30 }
 0x1db   : > { %3694 = vmatpush1.bf16.xpose.msra.mxu1 %v4543_v34  ;;  %v4599_v34 = vcombine.low %v439_v21, %v443_v22  ;;  %v496_v21 = vld [vmem:[%s5219_s3 + $0x8a0] sm:$0xff] }
 0x1dc   : > { %3695 = vmatprep.subr.bf16.mxu1 %v4552_v38  ;;  %v4608_v38 = vcombine.high %v447_v39, %v451_v32  ;;  %v620_v22 = vld [vmem:[%s5219_s3 + $0xc80] sm:$0xff] }
 0x1e1   : > { %3532 = vmatpush1.bf16.xpose.msra.mxu0 %v4423_v36  ;;  %v4479_v36 = vcombine.low %v319_v29, %v323_v30  ;;  %v500_v30 = vld [vmem:[%s5219_s3 + $0x8c0] sm:$0xff] }
 0x1e2   : > { %3533 = vmatprep.subr.bf16.mxu0 %v4432_v48  ;;  %v4488_v48 = vcombine.high %v327_v40, %v331_v43 }
 0x1e3   : > { %3696 = vmatpush1.bf16.xpose.msra.mxu1 %v4551_v46  ;;  %v4607_v46 = vcombine.low %v447_v39, %v451_v32  ;;  %v504_v39 = vld [vmem:[%s5219_s3 + $0x8e0] sm:$0xff] }
 0x1e4   : > { %3697 = vmatprep.subr.bf16.mxu1 %v4560_v49  ;;  %v4616_v49 = vcombine.high %v455_v44, %v459_v45  ;;  %v628_v32 = vld [vmem:[%s5219_s3 + $0xcc0] sm:$0xff] }
 0x1e9   : > { %3534 = vmatpush1.bf16.xpose.msra.mxu0 %v4431_v55  ;;  %v4487_v55 = vcombine.low %v327_v40, %v331_v43  ;;  %v508_v43 = vld [vmem:[%s5219_s3 + $0x900] sm:$0xff] }
 0x1ea   : > { %3535 = vmatprep.subr.bf16.mxu0 %v4440_v57  ;;  %v4496_v57 = vcombine.high %v335_v51, %v339_v52 }
 0x1eb   : > { %3698 = vmatpush1.bf16.xpose.msra.mxu1 %v4559_v56  ;;  %v4615_v56 = vcombine.low %v455_v44, %v459_v45  ;;  %v512_v44 = vld [vmem:[%s5219_s3 + $0x920] sm:$0xff] }
 0x1ec   : > { %3699 = vmatprep.subr.bf16.mxu1 %v4568_v58  ;;  %v4624_v58 = vcombine.high %v463_v53, %v467_v54  ;;  %v636_v45 = vld [vmem:[%s5219_s3 + $0xd00] sm:$0xff] }
 0x1f1   : > { %3536 = vmatpush1.bf16.xpose.msra.mxu0 %v4439_v0  ;;  %v4495_v0 = vcombine.low %v335_v51, %v339_v52  ;;  %v516_v52 = vld [vmem:[%s5219_s3 + $0x940] sm:$0xff] }
 0x1f2   : > { %3537 = vmatprep.subr.bf16.mxu0 %v4448_v2  ;;  %v4504_v2 = vcombine.high %v343_v59, %v347_v60 }
 0x1f3   : > { %3700 = vmatpush1.bf16.xpose.msra.mxu1 %v4567_v1  ;;  %v4623_v1 = vcombine.low %v463_v53, %v467_v54  ;;  %v520_v53 = vld [vmem:[%s5219_s3 + $0x960] sm:$0xff] }
 0x1f4   : > { %3701 = vmatprep.subr.bf16.mxu1 %v4576_v3  ;;  %v4632_v3 = vcombine.high %v471_v62, %v475_v63  ;;  %v644_v54 = vld [vmem:[%s5219_s3 + $0xd40] sm:$0xff] }
 0x1f9   : > { %3538 = vmatpush1.bf16.xpose.msra.mxu0 %v4447_v7  ;;  %v4503_v7 = vcombine.low %v343_v59, %v347_v60  ;;  %v524_v60 = vld [vmem:[%s5219_s3 + $0x980] sm:$0xff] }
 0x1fa   : > { %3539 = vmatprep.subr.bf16.mxu0 %v4456_v9  ;;  %v4634_v9 = vcombine.high %v476_v35, %v480_v41 }
 0x1fb   : > { %3702 = vmatpush1.bf16.xpose.msra.mxu1 %v4575_v8  ;;  %v4631_v8 = vcombine.low %v471_v62, %v475_v63  ;;  %v528_v62 = vld [vmem:[%s5219_s3 + $0x9a0] sm:$0xff] }
 0x1fc   : > { %3703 = vmatprep.subr.bf16.mxu1 %v4584_v10  ;;  %v4762_v10 = vcombine.high %v604_v5, %v608_v6  ;;  %v652_v63 = vld [vmem:[%s5219_s3 + $0xd80] sm:$0xff] }
 0x201   : > { %3540 = vmatpush1.bf16.xpose.msra.mxu0 %v4455_v15  ;;  %v616_v15 = vld [vmem:[%s5219_s3 + $0xc60] sm:$0xff] }
 0x202   : > { %3541 = vmatprep.subr.bf16.mxu0 %v4464_v17  ;;  %v4761_v17 = vcombine.low %v604_v5, %v608_v6  ;;  %v4770_v19 = vcombine.high %v612_v14, %v616_v15  ;;  %v536_v5 = vld [vmem:[%s5219_s3 + $0x9e0] sm:$0xff] }
 0x203   : > { %3704 = vmatpush1.bf16.xpose.msra.mxu1 %v4583_v16  ;;  %v4633_v16 = vcombine.low %v476_v35, %v480_v41  ;;  %v532_v41 = vld [vmem:[%s5219_s3 + $0x9c0] sm:$0xff] }
 0x204   : > { %3705 = vmatprep.subr.bf16.mxu1 %v4592_v18  ;;  %v4642_v18 = vcombine.high %v484_v11, %v488_v12  ;;  %v660_v6 = vld [vmem:[%s5219_s3 + $0xdc0] sm:$0xff] }
 0x209   : > { %3542 = vmatpush1.bf16.xpose.msra.mxu0 %v4463_v24  ;;  %v624_v24 = vld [vmem:[%s5219_s3 + $0xca0] sm:$0xff] }
 0x20a   : > { %3543 = vmatprep.subr.bf16.mxu0 %v4472_v26  ;;  %v4769_v26 = vcombine.low %v612_v14, %v616_v15  ;;  %v4778_v29 = vcombine.high %v620_v22, %v624_v24  ;;  %v544_v14 = vld [vmem:[%s5219_s3 + $0xa20] sm:$0xff] }
 0x20b   : > { %3706 = vmatpush1.bf16.xpose.msra.mxu1 %v4591_v25  ;;  %v4641_v25 = vcombine.low %v484_v11, %v488_v12  ;;  %v540_v12 = vld [vmem:[%s5219_s3 + $0xa00] sm:$0xff] }
 0x20c   : > { %3707 = vmatprep.subr.bf16.mxu1 %v4600_v27  ;;  %v4650_v27 = vcombine.high %v492_v20, %v496_v21  ;;  %v668_v15 = vld [vmem:[%s5219_s3 + $0xe00] sm:$0xff] }
 0x211   : > { %3544 = vmatpush1.bf16.xpose.msra.mxu0 %v4471_v33  ;;  %v632_v33 = vld [vmem:[%s5219_s3 + $0xce0] sm:$0xff] }
 0x212   : > { %3545 = vmatprep.subr.bf16.mxu0 %v4480_v37  ;;  %v4777_v37 = vcombine.low %v620_v22, %v624_v24  ;;  %v4786_v40 = vcombine.high %v628_v32, %v632_v33  ;;  %v552_v22 = vld [vmem:[%s5219_s3 + $0xa60] sm:$0xff] }
 0x213   : > { %3708 = vmatpush1.bf16.xpose.msra.mxu1 %v4599_v34  ;;  %v4649_v34 = vcombine.low %v492_v20, %v496_v21  ;;  %v548_v21 = vld [vmem:[%s5219_s3 + $0xa40] sm:$0xff] }
 0x214   : > { %3709 = vmatprep.subr.bf16.mxu1 %v4608_v38  ;;  %v4658_v38 = vcombine.high %v500_v30, %v504_v39  ;;  %v676_v24 = vld [vmem:[%s5219_s3 + $0xe40] sm:$0xff] }
 0x219   : > { %3546 = vmatpush1.bf16.xpose.msra.mxu0 %v4479_v36  ;;  %v640_v36 = vld [vmem:[%s5219_s3 + $0xd20] sm:$0xff] }
 0x21a   : > { %3547 = vmatprep.subr.bf16.mxu0 %v4488_v48  ;;  %v4785_v48 = vcombine.low %v628_v32, %v632_v33  ;;  %v4794_v51 = vcombine.high %v636_v45, %v640_v36  ;;  %v560_v32 = vld [vmem:[%s5219_s3 + $0xaa0] sm:$0xff] }
 0x21b   : > { %3710 = vmatpush1.bf16.xpose.msra.mxu1 %v4607_v46  ;;  %v4657_v46 = vcombine.low %v500_v30, %v504_v39  ;;  %v556_v39 = vld [vmem:[%s5219_s3 + $0xa80] sm:$0xff] }
 0x21c   : > { %3711 = vmatprep.subr.bf16.mxu1 %v4616_v49  ;;  %v4666_v49 = vcombine.high %v508_v43, %v512_v44  ;;  %v684_v33 = vld [vmem:[%s5219_s3 + $0xe80] sm:$0xff] }
 0x221   : > { %3548 = vmatpush1.bf16.xpose.msra.mxu0 %v4487_v55  ;;  %v648_v55 = vld [vmem:[%s5219_s3 + $0xd60] sm:$0xff] }
 0x222   : > { %3549 = vmatprep.subr.bf16.mxu0 %v4496_v57  ;;  %v4793_v57 = vcombine.low %v636_v45, %v640_v36  ;;  %v4802_v59 = vcombine.high %v644_v54, %v648_v55  ;;  %v568_v45 = vld [vmem:[%s5219_s3 + $0xae0] sm:$0xff] }
 0x223   : > { %3712 = vmatpush1.bf16.xpose.msra.mxu1 %v4615_v56  ;;  %v4665_v56 = vcombine.low %v508_v43, %v512_v44  ;;  %v564_v44 = vld [vmem:[%s5219_s3 + $0xac0] sm:$0xff] }
 0x224   : > { %3713 = vmatprep.subr.bf16.mxu1 %v4624_v58  ;;  %v4674_v58 = vcombine.high %v516_v52, %v520_v53  ;;  %v692_v36 = vld [vmem:[%s5219_s3 + $0xec0] sm:$0xff] }
 0x229   : > { %3550 = vmatpush1.bf16.xpose.msra.mxu0 %v4495_v0  ;;  %v656_v0 = vld [vmem:[%s5219_s3 + $0xda0] sm:$0xff] }
 0x22a   : > { %3551 = vmatprep.subr.bf16.mxu0 %v4504_v2  ;;  %v4801_v2 = vcombine.low %v644_v54, %v648_v55  ;;  %v4810_v35 = vcombine.high %v652_v63, %v656_v0  ;;  %v576_v54 = vld [vmem:[%s5219_s3 + $0xb20] sm:$0xff] }
 0x22b   : > { %3714 = vmatpush1.bf16.xpose.msra.mxu1 %v4623_v1  ;;  %v4673_v1 = vcombine.low %v516_v52, %v520_v53  ;;  %v572_v53 = vld [vmem:[%s5219_s3 + $0xb00] sm:$0xff] }
 0x22c   : > { %3715 = vmatprep.subr.bf16.mxu1 %v4632_v3  ;;  %v4682_v3 = vcombine.high %v524_v60, %v528_v62  ;;  %v700_v55 = vld [vmem:[%s5219_s3 + $0xf00] sm:$0xff] }
 0x231   : > { %3552 = vmatpush1.bf16.xpose.msra.mxu0 %v4503_v7  ;;  %v664_v7 = vld [vmem:[%s5219_s3 + $0xde0] sm:$0xff] }
 0x232   : > { %3726 = vmatprep.subr.bf16.mxu0 %v4634_v9  ;;  %v4809_v9 = vcombine.low %v652_v63, %v656_v0  ;;  %v4818_v11 = vcombine.high %v660_v6, %v664_v7  ;;  %v584_v63 = vld [vmem:[%s5219_s3 + $0xb60] sm:$0xff] }
 0x233   : > { %3716 = vmatpush1.bf16.xpose.msra.mxu1 %v4631_v8  ;;  %v4681_v8 = vcombine.low %v524_v60, %v528_v62  ;;  %v580_v62 = vld [vmem:[%s5219_s3 + $0xb40] sm:$0xff] }
 0x234   : > { %3890 = vmatprep.subr.bf16.mxu1 %v4762_v10  ;;  %v4690_v10 = vcombine.high %v532_v41, %v536_v5  ;;  %v708_v0 = vld [vmem:[%s5219_s3 + $0xf40] sm:$0xff] }
 0x238   : > { %3554 = vmatmul.mubr.bf16.vlgmr.msra.gmra.mrb[0].mxu0 %v5553_v13 }
 0x239   : > { %3727 = vmatpush1.bf16.xpose.msra.mxu0 %v4633_v16  ;;  %3758 = vmatprep.mubr.bf16.mxu0 %v5263_v47  ;;  %v672_v16 = vld [vmem:[%s5219_s3 + $0xe20] sm:$0xff] }
 0x23a   : > { %3718 = vmatmul.mubr.bf16.vlgmr.msra.gmra.mrb[0].mxu1 %v5553_v13  ;;  %3728 = vmatprep.subr.bf16.mxu0 %v4642_v18  ;;  %v4817_v18 = vcombine.low %v660_v6, %v664_v7  ;;  %v4826_v20 = vcombine.high %v668_v15, %v672_v16  ;;  %v592_v6 = vld [vmem:[%s5219_s3 + $0xba0] sm:$0xff] }
 0x23b   : > { %3891 = vmatpush1.bf16.xpose.msra.mxu1 %v4761_v17  ;;  %3922 = vmatprep.mubr.bf16.mxu1 %v5263_v47  ;;  %v4689_v17 = vcombine.low %v532_v41, %v536_v5  ;;  %v588_v5 = vld [vmem:[%s5219_s3 + $0xb80] sm:$0xff] }
 0x23c   : > { %3892 = vmatprep.subr.bf16.mxu1 %v4770_v19  ;;  %v4698_v19 = vcombine.high %v540_v12, %v544_v14  ;;  %v716_v7 = vld [vmem:[%s5219_s3 + $0xf80] sm:$0xff] }
 0x241   : > { %3729 = vmatpush1.bf16.xpose.msra.mxu0 %v4641_v25  ;;  %v680_v25 = vld [vmem:[%s5219_s3 + $0xe60] sm:$0xff] }
 0x242   : > { %3730 = vmatprep.subr.bf16.mxu0 %v4650_v27  ;;  %v4825_v27 = vcombine.low %v668_v15, %v672_v16  ;;  %v4834_v30 = vcombine.high %v676_v24, %v680_v25  ;;  %v600_v15 = vld [vmem:[%s5219_s3 + $0xbe0] sm:$0xff] }
 0x243   : > { %3893 = vmatpush1.bf16.xpose.msra.mxu1 %v4769_v26  ;;  %v4697_v26 = vcombine.low %v540_v12, %v544_v14  ;;  %v596_v14 = vld [vmem:[%s5219_s3 + $0xbc0] sm:$0xff] }
 0x244   : > { %3894 = vmatprep.subr.bf16.mxu1 %v4778_v29  ;;  %v4706_v29 = vcombine.high %v548_v21, %v552_v22  ;;  %v724_v16 = vld [vmem:[%s5219_s3 + $0xfc0] sm:$0xff] }
 0x249   : > { %3731 = vmatpush1.bf16.xpose.msra.mxu0 %v4649_v34  ;;  %v688_v34 = vld [vmem:[%s5219_s3 + $0xea0] sm:$0xff] }
 0x24a   : > { %3732 = vmatprep.subr.bf16.mxu0 %v4658_v38  ;;  %v4833_v38 = vcombine.low %v676_v24, %v680_v25  ;;  %v4842_v43 = vcombine.high %v684_v33, %v688_v34  ;;  %v481_v24 = vld [vmem:[%s5219_s3 + $0x828] sm:$0xff] }
 0x24b   : > { %3895 = vmatpush1.bf16.xpose.msra.mxu1 %v4777_v37  ;;  %v4705_v37 = vcombine.low %v548_v21, %v552_v22  ;;  %v477_v22 = vld [vmem:[%s5219_s3 + $0x808] sm:$0xff] }
 0x24c   : > { %3896 = vmatprep.subr.bf16.mxu1 %v4786_v40  ;;  %v4714_v40 = vcombine.high %v556_v39, %v560_v32  ;;  %v605_v25 = vld [vmem:[%s5219_s3 + $0xc08] sm:$0xff] }
 0x251   : > { %3733 = vmatpush1.bf16.xpose.msra.mxu0 %v4657_v46  ;;  %v696_v46 = vld [vmem:[%s5219_s3 + $0xee0] sm:$0xff] }
 0x252   : > { %3734 = vmatprep.subr.bf16.mxu0 %v4666_v49  ;;  %v4841_v49 = vcombine.low %v684_v33, %v688_v34  ;;  %v4850_v52 = vcombine.high %v692_v36, %v696_v46  ;;  %v489_v33 = vld [vmem:[%s5219_s3 + $0x868] sm:$0xff] }
 0x253   : > { %3897 = vmatpush1.bf16.xpose.msra.mxu1 %v4785_v48  ;;  %v4713_v48 = vcombine.low %v556_v39, %v560_v32  ;;  %v485_v32 = vld [vmem:[%s5219_s3 + $0x848] sm:$0xff] }
 0x254   : > { %3898 = vmatprep.subr.bf16.mxu1 %v4794_v51  ;;  %v4722_v51 = vcombine.high %v564_v44, %v568_v45  ;;  %v613_v34 = vld [vmem:[%s5219_s3 + $0xc48] sm:$0xff] }
 0x259   : > { %3735 = vmatpush1.bf16.xpose.msra.mxu0 %v4665_v56  ;;  %v704_v56 = vld [vmem:[%s5219_s3 + $0xf20] sm:$0xff] }
 0x25a   : > { %3736 = vmatprep.subr.bf16.mxu0 %v4674_v58  ;;  %v4849_v58 = vcombine.low %v692_v36, %v696_v46  ;;  %v4858_v60 = vcombine.high %v700_v55, %v704_v56  ;;  %v497_v36 = vld [vmem:[%s5219_s3 + $0x8a8] sm:$0xff] }
 0x25b   : > { %3899 = vmatpush1.bf16.xpose.msra.mxu1 %v4793_v57  ;;  %v4721_v57 = vcombine.low %v564_v44, %v568_v45  ;;  %v493_v45 = vld [vmem:[%s5219_s3 + $0x888] sm:$0xff] }
 0x25c   : > { %3900 = vmatprep.subr.bf16.mxu1 %v4802_v59  ;;  %v4730_v59 = vcombine.high %v572_v53, %v576_v54  ;;  %v621_v46 = vld [vmem:[%s5219_s3 + $0xc88] sm:$0xff] }
 0x261   : > { %3737 = vmatpush1.bf16.xpose.msra.mxu0 %v4673_v1  ;;  %v712_v1 = vld [vmem:[%s5219_s3 + $0xf60] sm:$0xff] }
 0x262   : > { %3738 = vmatprep.subr.bf16.mxu0 %v4682_v3  ;;  %v4857_v3 = vcombine.low %v700_v55, %v704_v56  ;;  %v4866_v41 = vcombine.high %v708_v0, %v712_v1  ;;  %v505_v55 = vld [vmem:[%s5219_s3 + $0x8e8] sm:$0xff] }
 0x263   : > { %3901 = vmatpush1.bf16.xpose.msra.mxu1 %v4801_v2  ;;  %v4729_v2 = vcombine.low %v572_v53, %v576_v54  ;;  %v501_v54 = vld [vmem:[%s5219_s3 + $0x8c8] sm:$0xff] }
 0x264   : > { %3902 = vmatprep.subr.bf16.mxu1 %v4810_v35  ;;  %v4738_v35 = vcombine.high %v580_v62, %v584_v63  ;;  %v629_v56 = vld [vmem:[%s5219_s3 + $0xcc8] sm:$0xff] }
 0x269   : > { %3739 = vmatpush1.bf16.xpose.msra.mxu0 %v4681_v8  ;;  %v720_v8 = vld [vmem:[%s5219_s3 + $0xfa0] sm:$0xff] }
 0x26a   : > { %3740 = vmatprep.subr.bf16.mxu0 %v4690_v10  ;;  %v4865_v10 = vcombine.low %v708_v0, %v712_v1  ;;  %v4874_v12 = vcombine.high %v716_v7, %v720_v8  ;;  %v513_v0 = vld [vmem:[%s5219_s3 + $0x928] sm:$0xff] }
 0x26b   : > { %3903 = vmatpush1.bf16.xpose.msra.mxu1 %v4809_v9  ;;  %v4737_v9 = vcombine.low %v580_v62, %v584_v63  ;;  %v509_v63 = vld [vmem:[%s5219_s3 + $0x908] sm:$0xff] }
 0x26c   : > { %3904 = vmatprep.subr.bf16.mxu1 %v4818_v11  ;;  %v4746_v11 = vcombine.high %v588_v5, %v592_v6  ;;  %v637_v1 = vld [vmem:[%s5219_s3 + $0xd08] sm:$0xff] }
 0x271   : > { %3741 = vmatpush1.bf16.xpose.msra.mxu0 %v4689_v17  ;;  %v728_v17 = vld [vmem:[%s5219_s3 + $0xfe0] sm:$0xff] }
 0x272   : > { %3742 = vmatprep.subr.bf16.mxu0 %v4698_v19  ;;  %v4873_v19 = vcombine.low %v716_v7, %v720_v8  ;;  %v4882_v21 = vcombine.high %v724_v16, %v728_v17  ;;  %v521_v7 = vld [vmem:[%s5219_s3 + $0x968] sm:$0xff] }
 0x273   : > { %3905 = vmatpush1.bf16.xpose.msra.mxu1 %v4817_v18  ;;  %v4745_v18 = vcombine.low %v588_v5, %v592_v6  ;;  %v517_v6 = vld [vmem:[%s5219_s3 + $0x948] sm:$0xff] }
 0x274   : > { %3906 = vmatprep.subr.bf16.mxu1 %v4826_v20  ;;  %v4754_v20 = vcombine.high %v596_v14, %v600_v15  ;;  %v645_v8 = vld [vmem:[%s5219_s3 + $0xd48] sm:$0xff] }
 0x279   : > { %3743 = vmatpush1.bf16.xpose.msra.mxu0 %v4697_v26  ;;  %v609_v26 = vld [vmem:[%s5219_s3 + $0xc28] sm:$0xff] }
 0x27a   : > { %3744 = vmatprep.subr.bf16.mxu0 %v4706_v29  ;;  %v4881_v29 = vcombine.low %v724_v16, %v728_v17  ;;  %v4764_v39 = vcombine.high %v605_v25, %v609_v26  ;;  %v529_v16 = vld [vmem:[%s5219_s3 + $0x9a8] sm:$0xff] }
 0x27b   : > { %3907 = vmatpush1.bf16.xpose.msra.mxu1 %v4825_v27  ;;  %v4753_v27 = vcombine.low %v596_v14, %v600_v15  ;;  %v525_v15 = vld [vmem:[%s5219_s3 + $0x988] sm:$0xff] }
 0x27c   : > { %3908 = vmatprep.subr.bf16.mxu1 %v4834_v30  ;;  %v4636_v30 = vcombine.high %v477_v22, %v481_v24  ;;  %v653_v17 = vld [vmem:[%s5219_s3 + $0xd88] sm:$0xff] }
 0x281   : > { %3745 = vmatpush1.bf16.xpose.msra.mxu0 %v4705_v37  ;;  %v617_v37 = vld [vmem:[%s5219_s3 + $0xc68] sm:$0xff] }
 0x282   : > { %3746 = vmatprep.subr.bf16.mxu0 %v4714_v40  ;;  %v4763_v40 = vcombine.low %v605_v25, %v609_v26  ;;  %v4772_v44 = vcombine.high %v613_v34, %v617_v37  ;;  %v537_v25 = vld [vmem:[%s5219_s3 + $0x9e8] sm:$0xff] }
 0x283   : > { %3909 = vmatpush1.bf16.xpose.msra.mxu1 %v4833_v38  ;;  %v4635_v38 = vcombine.low %v477_v22, %v481_v24  ;;  %v533_v24 = vld [vmem:[%s5219_s3 + $0x9c8] sm:$0xff] }
 0x284   : > { %3910 = vmatprep.subr.bf16.mxu1 %v4842_v43  ;;  %v4644_v43 = vcombine.high %v485_v32, %v489_v33  ;;  %v661_v26 = vld [vmem:[%s5219_s3 + $0xdc8] sm:$0xff] }
 0x289   : > { %3747 = vmatpush1.bf16.xpose.msra.mxu0 %v4713_v48  ;;  %v625_v48 = vld [vmem:[%s5219_s3 + $0xca8] sm:$0xff] }
 0x28a   : > { %3748 = vmatprep.subr.bf16.mxu0 %v4722_v51  ;;  %v4771_v51 = vcombine.low %v613_v34, %v617_v37  ;;  %v4780_v53 = vcombine.high %v621_v46, %v625_v48  ;;  %v545_v34 = vld [vmem:[%s5219_s3 + $0xa28] sm:$0xff] }
 0x28b   : > { %3911 = vmatpush1.bf16.xpose.msra.mxu1 %v4841_v49  ;;  %v4643_v49 = vcombine.low %v485_v32, %v489_v33  ;;  %v541_v33 = vld [vmem:[%s5219_s3 + $0xa08] sm:$0xff] }
 0x28c   : > { %3912 = vmatprep.subr.bf16.mxu1 %v4850_v52  ;;  %v4652_v52 = vcombine.high %v493_v45, %v497_v36  ;;  %v669_v37 = vld [vmem:[%s5219_s3 + $0xe08] sm:$0xff] }
 0x291   : > { %3749 = vmatpush1.bf16.xpose.msra.mxu0 %v4721_v57  ;;  %v633_v57 = vld [vmem:[%s5219_s3 + $0xce8] sm:$0xff] }
 0x292   : > { %3750 = vmatprep.subr.bf16.mxu0 %v4730_v59  ;;  %v4779_v59 = vcombine.low %v621_v46, %v625_v48  ;;  %v4788_v62 = vcombine.high %v629_v56, %v633_v57  ;;  %v553_v46 = vld [vmem:[%s5219_s3 + $0xa68] sm:$0xff] }
 0x293   : > { %3913 = vmatpush1.bf16.xpose.msra.mxu1 %v4849_v58  ;;  %v4651_v58 = vcombine.low %v493_v45, %v497_v36  ;;  %v549_v36 = vld [vmem:[%s5219_s3 + $0xa48] sm:$0xff] }
 0x294   : > { %3914 = vmatprep.subr.bf16.mxu1 %v4858_v60  ;;  %v4660_v60 = vcombine.high %v501_v54, %v505_v55  ;;  %v677_v48 = vld [vmem:[%s5219_s3 + $0xe48] sm:$0xff] }
 0x299   : > { %3751 = vmatpush1.bf16.xpose.msra.mxu0 %v4729_v2  ;;  %v641_v2 = vld [vmem:[%s5219_s3 + $0xd28] sm:$0xff] }
 0x29a   : > { %3752 = vmatprep.subr.bf16.mxu0 %v4738_v35  ;;  %v4787_v35 = vcombine.low %v629_v56, %v633_v57  ;;  %v4796_v5 = vcombine.high %v637_v1, %v641_v2  ;;  %v561_v56 = vld [vmem:[%s5219_s3 + $0xaa8] sm:$0xff] }
 0x29b   : > { %3915 = vmatpush1.bf16.xpose.msra.mxu1 %v4857_v3  ;;  %v4659_v3 = vcombine.low %v501_v54, %v505_v55  ;;  %v557_v55 = vld [vmem:[%s5219_s3 + $0xa88] sm:$0xff] }
 0x29c   : > { %3916 = vmatprep.subr.bf16.mxu1 %v4866_v41  ;;  %v4668_v41 = vcombine.high %v509_v63, %v513_v0  ;;  %v685_v57 = vld [vmem:[%s5219_s3 + $0xe88] sm:$0xff] }
 0x2a1   : > { %3753 = vmatpush1.bf16.xpose.msra.mxu0 %v4737_v9  ;;  %v649_v9 = vld [vmem:[%s5219_s3 + $0xd68] sm:$0xff] }
 0x2a2   : > { %3754 = vmatprep.subr.bf16.mxu0 %v4746_v11  ;;  %v4795_v11 = vcombine.low %v637_v1, %v641_v2  ;;  %v4804_v14 = vcombine.high %v645_v8, %v649_v9  ;;  %v565_v2 = vld [vmem:[%s5219_s3 + $0xac8] sm:$0xff] }
 0x2a3   : > { %3917 = vmatpush1.bf16.xpose.msra.mxu1 %v4865_v10  ;;  %v4667_v10 = vcombine.low %v509_v63, %v513_v0  ;;  %v5109_v0 = vmov 1983009808  }
 0x2a4   : > { %3918 = vmatprep.subr.bf16.mxu1 %v4874_v12  ;;  %v4676_v12 = vcombine.high %v517_v6, %v521_v7  ;;  %v4226_v1 = vunpack.c.l.s4 %v5109_v0 }
 0x2a9   : > { %3755 = vmatpush1.bf16.xpose.msra.mxu0 %v4745_v18  ;;  %v657_v18 = vld [vmem:[%s5219_s3 + $0xda8] sm:$0xff] }
 0x2aa   : > { %3756 = vmatprep.subr.bf16.mxu0 %v4754_v20  ;;  %v4803_v20 = vcombine.low %v645_v8, %v649_v9  ;;  %v4812_v22 = vcombine.high %v653_v17, %v657_v18  ;;  %v4227_v8 = vunpack.c.0.s8 %v4226_v1 }
 0x2ab   : > { %3919 = vmatpush1.bf16.xpose.msra.mxu1 %v4873_v19  ;;  %v4675_v19 = vcombine.low %v517_v6, %v521_v7 }
 0x2ac   : > { %3920 = vmatprep.subr.bf16.mxu1 %v4882_v21  ;;  %v4684_v21 = vcombine.high %v525_v15, %v529_v16 }
 0x2b1   : > { %3757 = vmatpush1.bf16.xpose.msra.mxu0 %v4753_v27  ;;  %v665_v27 = vld [vmem:[%s5219_s3 + $0xde8] sm:$0xff] }
 0x2b2   : > { %3767 = vmatprep.subr.bf16.mxu0 %v4636_v30  ;;  %v4811_v30 = vcombine.low %v653_v17, %v657_v18  ;;  %v4820_v32 = vcombine.high %v661_v26, %v665_v27  ;;  %v701_v17 = vld [vmem:[%s5219_s3 + $0xf08] sm:$0xff] }
 0x2b3   : > { %3921 = vmatpush1.bf16.xpose.msra.mxu1 %v4881_v29  ;;  %v4683_v29 = vcombine.low %v525_v15, %v529_v16  ;;  %v705_v18 = vld [vmem:[%s5219_s3 + $0xf28] sm:$0xff] }
 0x2b4   : > { %3931 = vmatprep.subr.bf16.mxu1 %v4764_v39  ;;  %v4692_v39 = vcombine.high %v533_v24, %v537_v25 }
 0x2b8   : > { %3759 = vmatmul.mubr.bf16.vlgmr.msra.gmra.mrb[4].mxu0 %v5319_v23 }
 0x2b9   : > { %3768 = vmatpush1.bf16.xpose.msra.mxu0 %v4635_v38  ;;  %3799 = vmatprep.mubr.bf16.mxu0 %v5325_v31  ;;  %v673_v38 = vld [vmem:[%s5219_s3 + $0xe28] sm:$0xff] }
 0x2ba   : > { %3923 = vmatmul.mubr.bf16.vlgmr.msra.gmra.mrb[4].mxu1 %v5319_v23  ;;  %3769 = vmatprep.subr.bf16.mxu0 %v4644_v43  ;;  %v4819_v43 = vcombine.low %v661_v26, %v665_v27  ;;  %v4828_v45 = vcombine.high %v669_v37, %v673_v38 }
 0x2bb   : > { %3932 = vmatpush1.bf16.xpose.msra.mxu1 %v4763_v40  ;;  %3963 = vmatprep.mubr.bf16.mxu1 %v5325_v31  ;;  %v4691_v40 = vcombine.low %v533_v24, %v537_v25 }
 0x2bc   : > { %3933 = vmatprep.subr.bf16.mxu1 %v4772_v44  ;;  %v4700_v44 = vcombine.high %v541_v33, %v545_v34 }
 0x2c1   : > { %3770 = vmatpush1.bf16.xpose.msra.mxu0 %v4643_v49  ;;  %v681_v49 = vld [vmem:[%s5219_s3 + $0xe68] sm:$0xff] }
 0x2c2   : > { %3771 = vmatprep.subr.bf16.mxu0 %v4652_v52  ;;  %v4827_v52 = vcombine.low %v669_v37, %v673_v38  ;;  %v4836_v54 = vcombine.high %v677_v48, %v681_v49  ;;  %v585_v37 = vld [vmem:[%s5219_s3 + $0xb68] sm:$0xff] }
 0x2c3   : > { %3934 = vmatpush1.bf16.xpose.msra.mxu1 %v4771_v51  ;;  %v4699_v51 = vcombine.low %v541_v33, %v545_v34  ;;  %v581_v34 = vld [vmem:[%s5219_s3 + $0xb48] sm:$0xff] }
 0x2c4   : > { %3935 = vmatprep.subr.bf16.mxu1 %v4780_v53  ;;  %v4708_v53 = vcombine.high %v549_v36, %v553_v46  ;;  %v709_v38 = vld [vmem:[%s5219_s3 + $0xf48] sm:$0xff] }
 0x2c9   : > { %3772 = vmatpush1.bf16.xpose.msra.mxu0 %v4651_v58  ;;  %v689_v58 = vld [vmem:[%s5219_s3 + $0xea8] sm:$0xff] }
 0x2ca   : > { %3773 = vmatprep.subr.bf16.mxu0 %v4660_v60  ;;  %v4835_v60 = vcombine.low %v677_v48, %v681_v49  ;;  %v4844_v63 = vcombine.high %v685_v57, %v689_v58  ;;  %v4843_v6 = vcombine.low %v685_v57, %v689_v58  ;;  %v593_v48 = vld [vmem:[%s5219_s3 + $0xba8] sm:$0xff] }
 0x2cb   : > { %3936 = vmatpush1.bf16.xpose.msra.mxu1 %v4779_v59  ;;  %v4707_v59 = vcombine.low %v549_v36, %v553_v46  ;;  %v589_v46 = vld [vmem:[%s5219_s3 + $0xb88] sm:$0xff] }
 0x2cc   : > { %3937 = vmatprep.subr.bf16.mxu1 %v4788_v62  ;;  %v4716_v62 = vcombine.high %v557_v55, %v561_v56  ;;  %v717_v49 = vld [vmem:[%s5219_s3 + $0xf88] sm:$0xff] }
 0x2cd   : > { %v597_v57 = vld [vmem:[%s5219_s3 + $0xbc8] sm:$0xff] }
 0x2ce   : > { %v601_v58 = vld [vmem:[%s5219_s3 + $0xbe8] sm:$0xff] }
 0x2cf   : > { %v4756_v0 = vcombine.high %v597_v57, %v601_v58 }
 0x2d1   : > { %3774 = vmatpush1.bf16.xpose.msra.mxu0 %v4659_v3  ;;  %v569_v3 = vld [vmem:[%s5219_s3 + $0xae8] sm:$0xff] }
 0x2d2   : > { %3775 = vmatprep.subr.bf16.mxu0 %v4668_v41  ;;  %v697_v41 = vld [vmem:[%s5219_s3 + $0xee8] sm:$0xff]  ;;  %v4724_v7 = vcombine.high %v565_v2, %v569_v3 }
 0x2d3   : > { %3938 = vmatpush1.bf16.xpose.msra.mxu1 %v4787_v35  ;;  %v693_v35 = vld [vmem:[%s5219_s3 + $0xec8] sm:$0xff] }
 0x2d4   : > { %3939 = vmatprep.subr.bf16.mxu1 %v4796_v5  ;;  %v4715_v5 = vcombine.low %v557_v55, %v561_v56  ;;  %v4852_v9 = vcombine.high %v693_v35, %v697_v41  ;;  %v4748_v55 = vcombine.high %v589_v46, %v593_v48 }
 0x2d9   : > { %3776 = vmatpush1.bf16.xpose.msra.mxu0 %v4667_v10 }
 0x2da   : > { %3777 = vmatprep.subr.bf16.mxu0 %v4676_v12  ;;  %v573_v12 = vld [vmem:[%s5219_s3 + $0xb08] sm:$0xff] }
 0x2db   : > { %3940 = vmatpush1.bf16.xpose.msra.mxu1 %v4795_v11  ;;  %v5670_v11 = vsub.s32 %v4227_v8, %v5240_v28  ;;  %v4851_v28 = vcombine.low %v693_v35, %v697_v41  ;;  %v606_v35 = vld [vmem:[%s5219_s3 + $0xc10] sm:$0xff] }
 0x2dc   : > { %3941 = vmatprep.subr.bf16.mxu1 %v4804_v14  ;;  %v577_v14 = vld [vmem:[%s5219_s3 + $0xb28] sm:$0xff]  ;;  %v610_v41 = vld [vmem:[%s5219_s3 + $0xc30] sm:$0xff] }
 0x2dd   : > { %v4732_v27 = vcombine.high %v573_v12, %v577_v14  ;;  %v4766_v8 = vcombine.high %v606_v35, %v610_v41 }
 0x2e1   : > { %3778 = vmatpush1.bf16.xpose.msra.mxu0 %v4675_v19 }
 0x2e2   : > { %3779 = vmatprep.subr.bf16.mxu0 %v4684_v21 }
 0x2e3   : > { %3942 = vmatpush1.bf16.xpose.msra.mxu1 %v4803_v20 }
 0x2e4   : > { %3943 = vmatprep.subr.bf16.mxu1 %v4812_v22  ;;  %v4723_v22 = vcombine.low %v565_v2, %v569_v3  ;;  %v478_v2 = vld [vmem:[%s5219_s3 + $0x810] sm:$0xff] }
 0x2e5   : > { %v482_v3 = vld [vmem:[%s5219_s3 + $0x830] sm:$0xff] }
 0x2e9   : > { %3780 = vmatpush1.bf16.xpose.msra.mxu0 %v4683_v29 }
 0x2ea   : > { %3781 = vmatprep.subr.bf16.mxu0 %v4692_v39  ;;  %v4860_v39 = vcombine.high %v701_v17, %v705_v18 }
 0x2eb   : > { %3944 = vmatpush1.bf16.xpose.msra.mxu1 %v4811_v30 }
 0x2ec   : > { %3945 = vmatprep.subr.bf16.mxu1 %v4820_v32 }
 0x2f1   : > { %3782 = vmatpush1.bf16.xpose.msra.mxu0 %v4691_v40  ;;  %v713_v40 = vld [vmem:[%s5219_s3 + $0xf68] sm:$0xff] }
 0x2f2   : > { %3783 = vmatprep.subr.bf16.mxu0 %v4700_v44  ;;  %v4859_v44 = vcombine.low %v701_v17, %v705_v18  ;;  %v4868_v36 = vcombine.high %v709_v38, %v713_v40 }
 0x2f3   : > { %3946 = vmatpush1.bf16.xpose.msra.mxu1 %v4819_v43  ;;  %v4731_v43 = vcombine.low %v573_v12, %v577_v14  ;;  %v614_v12 = vld [vmem:[%s5219_s3 + $0xc50] sm:$0xff] }
 0x2f4   : > { %3947 = vmatprep.subr.bf16.mxu1 %v4828_v45  ;;  %v4740_v45 = vcombine.high %v581_v34, %v585_v37  ;;  %v618_v14 = vld [vmem:[%s5219_s3 + $0xc70] sm:$0xff] }
 0x2f5   : > { %v4774_v18 = vcombine.high %v614_v12, %v618_v14 }
 0x2f9   : > { %3784 = vmatpush1.bf16.xpose.msra.mxu0 %v4699_v51  ;;  %v721_v51 = vld [vmem:[%s5219_s3 + $0xfa8] sm:$0xff] }
 0x2fa   : > { %3785 = vmatprep.subr.bf16.mxu0 %v4708_v53  ;;  %v4876_v56 = vcombine.high %v717_v49, %v721_v51 }
 0x2fb   : > { %3948 = vmatpush1.bf16.xpose.msra.mxu1 %v4827_v52  ;;  %v4739_v52 = vcombine.low %v581_v34, %v585_v37 }
 0x2fc   : > { %3949 = vmatprep.subr.bf16.mxu1 %v4836_v54  ;;  %v4867_v54 = vcombine.low %v709_v38, %v713_v40  ;;  %v510_v38 = vld [vmem:[%s5219_s3 + $0x910] sm:$0xff] }
 0x2fd   : > { %v514_v40 = vld [vmem:[%s5219_s3 + $0x930] sm:$0xff] }
 0x301   : > { %3786 = vmatpush1.bf16.xpose.msra.mxu0 %v4707_v59  ;;  %v725_v59 = vld [vmem:[%s5219_s3 + $0xfc8] sm:$0xff] }
 0x302   : > { %3787 = vmatprep.subr.bf16.mxu0 %v4716_v62  ;;  %v4747_v62 = vcombine.low %v589_v46, %v593_v48  ;;  %v4670_v46 = vcombine.high %v510_v38, %v514_v40 }
 0x303   : > { %3950 = vmatpush1.bf16.xpose.msra.mxu1 %v4835_v60  ;;  %v729_v60 = vld [vmem:[%s5219_s3 + $0xfe8] sm:$0xff] }
 0x304   : > { %3951 = vmatprep.subr.bf16.mxu1 %v4844_v63  ;;  %v4875_v63 = vcombine.low %v717_v49, %v721_v51  ;;  %v4884_v1 = vcombine.high %v725_v59, %v729_v60  ;;  %v518_v49 = vld [vmem:[%s5219_s3 + $0x950] sm:$0xff] }
 0x305   : > { %v522_v51 = vld [vmem:[%s5219_s3 + $0x970] sm:$0xff] }
 0x309   : > { %3788 = vmatpush1.bf16.xpose.msra.mxu0 %v4715_v5  ;;  %v4755_v5 = vcombine.low %v597_v57, %v601_v58  ;;  %v526_v58 = vld [vmem:[%s5219_s3 + $0x990] sm:$0xff] }
 0x30a   : > { %3789 = vmatprep.subr.bf16.mxu0 %v4724_v7  ;;  %v4638_v7 = vcombine.high %v478_v2, %v482_v3 }
 0x30b   : > { %3952 = vmatpush1.bf16.xpose.msra.mxu1 %v4843_v6  ;;  %v3555_v10 = vpop.f32.mrb[0].mxu0  ;;  %v4883_v6 = vcombine.low %v725_v59, %v729_v60  ;;  %v530_v59 = vld [vmem:[%s5219_s3 + $0x9b0] sm:$0xff] }
 0x30c   : > { %3953 = vmatprep.subr.bf16.mxu1 %v4852_v9  ;;  %v3557_v16 = vpop.f32.mrb[1].mxu0  ;;  %v486_v9 = vld [vmem:[%s5219_s3 + $0x850] sm:$0xff] }
 0x30d   : > { %v3719_v15 = vpop.f32.mrb[0].mxu1  ;;  %v4223_v19 = vcombine.low %v3555_v10, %v3557_v16  ;;  %v3559_v21 = vpop.f32.mrb[2].mxu0  ;;  %v490_v10 = vld [vmem:[%s5219_s3 + $0x870] sm:$0xff]  ;;  %v4765_v16 = vcombine.low %v606_v35, %v610_v41 }
 0x30e   : > { %v3721_v20 = vpop.f32.mrb[1].mxu1  ;;  %v3560_v26 = vpop.f32.mrb[3].mxu0  ;;  %v4646_v17 = vcombine.high %v486_v9, %v490_v10  ;;  %v622_v21 = vld [vmem:[%s5219_s3 + $0xc90] sm:$0xff] }
 0x30f   : > { %v4224_v24 = vcombine.low %v3719_v15, %v3721_v20  ;;  %v3723_v25 = vpop.f32.mrb[2].mxu1  ;;  %v4231_v29 = vrot.slane %v4223_v19, %v5670_v11  ;;  %v4637_v15 = vcombine.low %v478_v2, %v482_v3  ;;  %v494_v19 = vld [vmem:[%s5219_s3 + $0x890] sm:$0xff] }
 0x310   : > { %v3724_v30 = vpop.f32.mrb[3].mxu1  ;;  %v498_v20 = vld [vmem:[%s5219_s3 + $0x8b0] sm:$0xff]  ;;  %v4773_v25 = vcombine.low %v614_v12, %v618_v14 }
 0x311   : > { %v4238_v32 = vrot.slane %v4224_v24, %v5670_v11  ;;  %3790 = vmatpush1.bf16.xpose.msra.mxu0 %v4723_v22  ;;  %v626_v22 = vld [vmem:[%s5219_s3 + $0xcb0] sm:$0xff]  ;;  %v4645_v24 = vcombine.low %v486_v9, %v490_v10  ;;  %v4654_v26 = vcombine.high %v494_v19, %v498_v20 }
 0x312   : > { %3791 = vmatprep.subr.bf16.mxu0 %v4732_v27  ;;  %v502_v27 = vld [vmem:[%s5219_s3 + $0x8d0] sm:$0xff] }
 0x313   : > { %v4239_v33 = vcombine.low %v4231_v29, %v4238_v32  ;;  %3954 = vmatpush1.bf16.xpose.msra.mxu1 %v4851_v28  ;;  %v4782_v28 = vcombine.high %v622_v21, %v626_v22  ;;  %v506_v29 = vld [vmem:[%s5219_s3 + $0x8f0] sm:$0xff]  ;;  %v4653_v32 = vcombine.low %v494_v19, %v498_v20 }
 0x314   : > { %3955 = vmatprep.subr.bf16.mxu1 %v4860_v39  ;;  %v630_v30 = vld [vmem:[%s5219_s3 + $0xcd0] sm:$0xff]  ;;  %v4662_v34 = vcombine.high %v502_v27, %v506_v29 }
 0x315   : > { %4270 = vst [vmem:[#allocation2] sm:$0xff] %v4239_v33  ;;  %v634_v39 = vld [vmem:[%s5219_s3 + $0xcf0] sm:$0xff]  ;;  %v4781_v33 = vcombine.low %v622_v21, %v626_v22 }
 0x316   : > { %v4790_v37 = vcombine.high %v630_v30, %v634_v39  ;;  %v654_v60 = vld [vmem:[%s5219_s3 + $0xd90] sm:$0xff] }
 0x317   : > { %v534_v3 = vld [vmem:[%s5219_s3 + $0x9d0] sm:$0xff] }
 0x318   : > { %v538_v35 = vld [vmem:[%s5219_s3 + $0x9f0] sm:$0xff] }
 0x319   : > { %3792 = vmatpush1.bf16.xpose.msra.mxu0 %v4731_v43  ;;  %v638_v43 = vld [vmem:[%s5219_s3 + $0xd10] sm:$0xff] }
 0x31a   : > { %3793 = vmatprep.subr.bf16.mxu0 %v4740_v45  ;;  %v4661_v45 = vcombine.low %v502_v27, %v506_v29  ;;  %v662_v41 = vld [vmem:[%s5219_s3 + $0xdd0] sm:$0xff] }
 0x31b   : > { %3956 = vmatpush1.bf16.xpose.msra.mxu1 %v4859_v44  ;;  %v642_v44 = vld [vmem:[%s5219_s3 + $0xd30] sm:$0xff] }
 0x31c   : > { %3957 = vmatprep.subr.bf16.mxu1 %v4868_v36  ;;  %v4277_v53 = vld [vmem:[#allocation2] sm:$0xff]  ;;  %v4789_v36 = vcombine.low %v630_v30, %v634_v39  ;;  %v4798_v48 = vcombine.high %v638_v43, %v642_v44 }
 0x31d   : > { %4280 = vst [vmem:[%s5689_s6] sm:$0xff] %v4277_v53  ;;  %v650_v53 = vld [vmem:[%s5219_s3 + $0xd70] sm:$0xff] }
 0x31e   : > { %v542_v10 = vld [vmem:[%s5219_s3 + $0xa10] sm:$0xff] }
 0x31f   : > { %v546_v12 = vld [vmem:[%s5219_s3 + $0xa30] sm:$0xff] }
 0x320   : > { %v670_v14 = vld [vmem:[%s5219_s3 + $0xe10] sm:$0xff] }
 0x321   : > { %3794 = vmatpush1.bf16.xpose.msra.mxu0 %v4739_v52  ;;  %v646_v52 = vld [vmem:[%s5219_s3 + $0xd50] sm:$0xff] }
 0x322   : > { %3795 = vmatprep.subr.bf16.mxu0 %v4748_v55  ;;  %v4797_v55 = vcombine.low %v638_v43, %v642_v44  ;;  %v4806_v57 = vcombine.high %v646_v52, %v650_v53  ;;  %v550_v20 = vld [vmem:[%s5219_s3 + $0xa50] sm:$0xff] }
 0x323   : > { %3958 = vmatpush1.bf16.xpose.msra.mxu1 %v4867_v54  ;;  %v4669_v54 = vcombine.low %v510_v38, %v514_v40  ;;  %v554_v21 = vld [vmem:[%s5219_s3 + $0xa70] sm:$0xff] }
 0x324   : > { %3959 = vmatprep.subr.bf16.mxu1 %v4876_v56  ;;  %v4678_v56 = vcombine.high %v518_v49, %v522_v51  ;;  %v678_v22 = vld [vmem:[%s5219_s3 + $0xe50] sm:$0xff] }
 0x325   : > { %v558_v29 = vld [vmem:[%s5219_s3 + $0xa90] sm:$0xff] }
 0x326   : > { %v562_v30 = vld [vmem:[%s5219_s3 + $0xab0] sm:$0xff] }
 0x327   : > { %v686_v39 = vld [vmem:[%s5219_s3 + $0xe90] sm:$0xff] }
 0x328   : > { %v566_v40 = vld [vmem:[%s5219_s3 + $0xad0] sm:$0xff] }
 0x329   : > { %3796 = vmatpush1.bf16.xpose.msra.mxu0 %v4747_v62  ;;  %v658_v62 = vld [vmem:[%s5219_s3 + $0xdb0] sm:$0xff] }
 0x32a   : > { %3797 = vmatprep.subr.bf16.mxu0 %v4756_v0  ;;  %v4805_v0 = vcombine.low %v646_v52, %v650_v53  ;;  %v4814_v2 = vcombine.high %v654_v60, %v658_v62  ;;  %v570_v43 = vld [vmem:[%s5219_s3 + $0xaf0] sm:$0xff] }
 0x32b   : > { %3960 = vmatpush1.bf16.xpose.msra.mxu1 %v4875_v63  ;;  %v4677_v63 = vcombine.low %v518_v49, %v522_v51  ;;  %v694_v44 = vld [vmem:[%s5219_s3 + $0xed0] sm:$0xff] }
 0x32c   : > { %3961 = vmatprep.subr.bf16.mxu1 %v4884_v1  ;;  %v4686_v1 = vcombine.high %v526_v58, %v530_v59  ;;  %v574_v51 = vld [vmem:[%s5219_s3 + $0xb10] sm:$0xff] }
 0x32d   : > { %v578_v52 = vld [vmem:[%s5219_s3 + $0xb30] sm:$0xff] }
 0x32e   : > { %v702_v53 = vld [vmem:[%s5219_s3 + $0xf10] sm:$0xff] }
 0x331   : > { %3798 = vmatpush1.bf16.xpose.msra.mxu0 %v4755_v5  ;;  %v666_v5 = vld [vmem:[%s5219_s3 + $0xdf0] sm:$0xff] }
 0x332   : > { %3808 = vmatprep.subr.bf16.mxu0 %v4638_v7  ;;  %v4813_v7 = vcombine.low %v654_v60, %v658_v62  ;;  %v4822_v9 = vcombine.high %v662_v41, %v666_v5  ;;  %v586_v60 = vld [vmem:[%s5219_s3 + $0xb70] sm:$0xff] }
 0x333   : > { %3962 = vmatpush1.bf16.xpose.msra.mxu1 %v4883_v6  ;;  %v4685_v6 = vcombine.low %v526_v58, %v530_v59  ;;  %v582_v59 = vld [vmem:[%s5219_s3 + $0xb50] sm:$0xff] }
 0x334   : > { %3972 = vmatprep.subr.bf16.mxu1 %v4766_v8  ;;  %v4694_v8 = vcombine.high %v534_v3, %v538_v35  ;;  %v710_v62 = vld [vmem:[%s5219_s3 + $0xf50] sm:$0xff] }
 0x338   : > { %3800 = vmatmul.mubr.bf16.vlgmr.msra.gmra.mrb[4].mxu0 %v5400_v42 }
 0x339   : > { %3809 = vmatpush1.bf16.xpose.msra.mxu0 %v4637_v15  ;;  %3840 = vmatprep.mubr.bf16.mxu0 %v5407_v50  ;;  %v674_v15 = vld [vmem:[%s5219_s3 + $0xe30] sm:$0xff] }
 0x33a   : > { %3964 = vmatmul.mubr.bf16.vlgmr.msra.gmra.mrb[4].mxu1 %v5400_v42  ;;  %3810 = vmatprep.subr.bf16.mxu0 %v4646_v17  ;;  %v4821_v17 = vcombine.low %v662_v41, %v666_v5  ;;  %v4830_v19 = vcombine.high %v670_v14, %v674_v15  ;;  %v594_v41 = vld [vmem:[%s5219_s3 + $0xbb0] sm:$0xff] }
 0x33b   : > { %3973 = vmatpush1.bf16.xpose.msra.mxu1 %v4765_v16  ;;  %4004 = vmatprep.mubr.bf16.mxu1 %v5407_v50  ;;  %v4693_v16 = vcombine.low %v534_v3, %v538_v35  ;;  %v590_v35 = vld [vmem:[%s5219_s3 + $0xb90] sm:$0xff] }
 0x33c   : > { %3974 = vmatprep.subr.bf16.mxu1 %v4774_v18  ;;  %v4702_v18 = vcombine.high %v542_v10, %v546_v12  ;;  %v718_v5 = vld [vmem:[%s5219_s3 + $0xf90] sm:$0xff] }
 0x341   : > { %3811 = vmatpush1.bf16.xpose.msra.mxu0 %v4645_v24  ;;  %v682_v24 = vld [vmem:[%s5219_s3 + $0xe70] sm:$0xff] }
 0x342   : > { %3812 = vmatprep.subr.bf16.mxu0 %v4654_v26  ;;  %v4829_v26 = vcombine.low %v670_v14, %v674_v15  ;;  %v4838_v27 = vcombine.high %v678_v22, %v682_v24  ;;  %v602_v14 = vld [vmem:[%s5219_s3 + $0xbf0] sm:$0xff] }
 0x343   : > { %3975 = vmatpush1.bf16.xpose.msra.mxu1 %v4773_v25  ;;  %v4701_v25 = vcombine.low %v542_v10, %v546_v12  ;;  %v598_v12 = vld [vmem:[%s5219_s3 + $0xbd0] sm:$0xff] }
 0x344   : > { %3976 = vmatprep.subr.bf16.mxu1 %v4782_v28  ;;  %v4710_v28 = vcombine.high %v550_v20, %v554_v21  ;;  %v726_v15 = vld [vmem:[%s5219_s3 + $0xfd0] sm:$0xff] }
 0x349   : > { %3813 = vmatpush1.bf16.xpose.msra.mxu0 %v4653_v32  ;;  %v690_v32 = vld [vmem:[%s5219_s3 + $0xeb0] sm:$0xff] }
 0x34a   : > { %3814 = vmatprep.subr.bf16.mxu0 %v4662_v34  ;;  %v4837_v34 = vcombine.low %v678_v22, %v682_v24  ;;  %v4846_v38 = vcombine.high %v686_v39, %v690_v32  ;;  %v483_v22 = vld [vmem:[%s5219_s3 + $0x838] sm:$0xff] }
 0x34b   : > { %3977 = vmatpush1.bf16.xpose.msra.mxu1 %v4781_v33  ;;  %v4709_v33 = vcombine.low %v550_v20, %v554_v21  ;;  %v479_v21 = vld [vmem:[%s5219_s3 + $0x818] sm:$0xff] }
 0x34c   : > { %3978 = vmatprep.subr.bf16.mxu1 %v4790_v37  ;;  %v4718_v37 = vcombine.high %v558_v29, %v562_v30  ;;  %v607_v24 = vld [vmem:[%s5219_s3 + $0xc18] sm:$0xff] }
 0x351   : > { %3815 = vmatpush1.bf16.xpose.msra.mxu0 %v4661_v45  ;;  %v698_v45 = vld [vmem:[%s5219_s3 + $0xef0] sm:$0xff] }
 0x352   : > { %3816 = vmatprep.subr.bf16.mxu0 %v4670_v46  ;;  %v4845_v46 = vcombine.low %v686_v39, %v690_v32  ;;  %v4854_v49 = vcombine.high %v694_v44, %v698_v45  ;;  %v491_v39 = vld [vmem:[%s5219_s3 + $0x878] sm:$0xff] }
 0x353   : > { %3979 = vmatpush1.bf16.xpose.msra.mxu1 %v4789_v36  ;;  %v4717_v36 = vcombine.low %v558_v29, %v562_v30  ;;  %v487_v30 = vld [vmem:[%s5219_s3 + $0x858] sm:$0xff] }
 0x354   : > { %3980 = vmatprep.subr.bf16.mxu1 %v4798_v48  ;;  %v4726_v48 = vcombine.high %v566_v40, %v570_v43  ;;  %v615_v32 = vld [vmem:[%s5219_s3 + $0xc58] sm:$0xff] }
 0x359   : > { %3817 = vmatpush1.bf16.xpose.msra.mxu0 %v4669_v54  ;;  %v706_v54 = vld [vmem:[%s5219_s3 + $0xf30] sm:$0xff] }
 0x35a   : > { %3818 = vmatprep.subr.bf16.mxu0 %v4678_v56  ;;  %v4853_v56 = vcombine.low %v694_v44, %v698_v45  ;;  %v4862_v58 = vcombine.high %v702_v53, %v706_v54  ;;  %v499_v44 = vld [vmem:[%s5219_s3 + $0x8b8] sm:$0xff] }
 0x35b   : > { %3981 = vmatpush1.bf16.xpose.msra.mxu1 %v4797_v55  ;;  %v4725_v55 = vcombine.low %v566_v40, %v570_v43  ;;  %v495_v43 = vld [vmem:[%s5219_s3 + $0x898] sm:$0xff] }
 0x35c   : > { %3982 = vmatprep.subr.bf16.mxu1 %v4806_v57  ;;  %v4734_v57 = vcombine.high %v574_v51, %v578_v52  ;;  %v623_v45 = vld [vmem:[%s5219_s3 + $0xc98] sm:$0xff] }
 0x361   : > { %3819 = vmatpush1.bf16.xpose.msra.mxu0 %v4677_v63  ;;  %v714_v63 = vld [vmem:[%s5219_s3 + $0xf70] sm:$0xff] }
 0x362   : > { %3820 = vmatprep.subr.bf16.mxu0 %v4686_v1  ;;  %v4861_v1 = vcombine.low %v702_v53, %v706_v54  ;;  %v4870_v3 = vcombine.high %v710_v62, %v714_v63  ;;  %v507_v53 = vld [vmem:[%s5219_s3 + $0x8f8] sm:$0xff] }
 0x363   : > { %3983 = vmatpush1.bf16.xpose.msra.mxu1 %v4805_v0  ;;  %v4733_v0 = vcombine.low %v574_v51, %v578_v52  ;;  %v503_v52 = vld [vmem:[%s5219_s3 + $0x8d8] sm:$0xff] }
 0x364   : > { %3984 = vmatprep.subr.bf16.mxu1 %v4814_v2  ;;  %v4742_v2 = vcombine.high %v582_v59, %v586_v60  ;;  %v631_v54 = vld [vmem:[%s5219_s3 + $0xcd8] sm:$0xff] }
 0x369   : > { %3821 = vmatpush1.bf16.xpose.msra.mxu0 %v4685_v6  ;;  %v722_v6 = vld [vmem:[%s5219_s3 + $0xfb0] sm:$0xff] }
 0x36a   : > { %3822 = vmatprep.subr.bf16.mxu0 %v4694_v8  ;;  %v4869_v8 = vcombine.low %v710_v62, %v714_v63  ;;  %v4878_v10 = vcombine.high %v718_v5, %v722_v6  ;;  %v515_v62 = vld [vmem:[%s5219_s3 + $0x938] sm:$0xff] }
 0x36b   : > { %3985 = vmatpush1.bf16.xpose.msra.mxu1 %v4813_v7  ;;  %v4741_v7 = vcombine.low %v582_v59, %v586_v60  ;;  %v511_v60 = vld [vmem:[%s5219_s3 + $0x918] sm:$0xff] }
 0x36c   : > { %3986 = vmatprep.subr.bf16.mxu1 %v4822_v9  ;;  %v4750_v9 = vcombine.high %v590_v35, %v594_v41  ;;  %v639_v63 = vld [vmem:[%s5219_s3 + $0xd18] sm:$0xff] }
 0x371   : > { %3823 = vmatpush1.bf16.xpose.msra.mxu0 %v4693_v16  ;;  %v730_v16 = vld [vmem:[%s5219_s3 + $0xff0] sm:$0xff] }
 0x372   : > { %3824 = vmatprep.subr.bf16.mxu0 %v4702_v18  ;;  %v4877_v18 = vcombine.low %v718_v5, %v722_v6  ;;  %v4886_v20 = vcombine.high %v726_v15, %v730_v16  ;;  %v523_v5 = vld [vmem:[%s5219_s3 + $0x978] sm:$0xff] }
 0x373   : > { %3987 = vmatpush1.bf16.xpose.msra.mxu1 %v4821_v17  ;;  %v4749_v17 = vcombine.low %v590_v35, %v594_v41  ;;  %v519_v41 = vld [vmem:[%s5219_s3 + $0x958] sm:$0xff] }
 0x374   : > { %3988 = vmatprep.subr.bf16.mxu1 %v4830_v19  ;;  %v4758_v19 = vcombine.high %v598_v12, %v602_v14  ;;  %v647_v6 = vld [vmem:[%s5219_s3 + $0xd58] sm:$0xff] }
 0x379   : > { %3825 = vmatpush1.bf16.xpose.msra.mxu0 %v4701_v25  ;;  %v611_v25 = vld [vmem:[%s5219_s3 + $0xc38] sm:$0xff] }
 0x37a   : > { %3826 = vmatprep.subr.bf16.mxu0 %v4710_v28  ;;  %v4885_v28 = vcombine.low %v726_v15, %v730_v16  ;;  %v4768_v29 = vcombine.high %v607_v24, %v611_v25  ;;  %v531_v15 = vld [vmem:[%s5219_s3 + $0x9b8] sm:$0xff] }
 0x37b   : > { %3989 = vmatpush1.bf16.xpose.msra.mxu1 %v4829_v26  ;;  %v4757_v26 = vcombine.low %v598_v12, %v602_v14  ;;  %v527_v14 = vld [vmem:[%s5219_s3 + $0x998] sm:$0xff] }
 0x37c   : > { %3990 = vmatprep.subr.bf16.mxu1 %v4838_v27  ;;  %v4640_v27 = vcombine.high %v479_v21, %v483_v22  ;;  %v655_v16 = vld [vmem:[%s5219_s3 + $0xd98] sm:$0xff] }
 0x381   : > { %3827 = vmatpush1.bf16.xpose.msra.mxu0 %v4709_v33  ;;  %v619_v33 = vld [vmem:[%s5219_s3 + $0xc78] sm:$0xff] }
 0x382   : > { %3828 = vmatprep.subr.bf16.mxu0 %v4718_v37  ;;  %v4767_v37 = vcombine.low %v607_v24, %v611_v25  ;;  %v4776_v40 = vcombine.high %v615_v32, %v619_v33  ;;  %v539_v24 = vld [vmem:[%s5219_s3 + $0x9f8] sm:$0xff] }
 0x383   : > { %3991 = vmatpush1.bf16.xpose.msra.mxu1 %v4837_v34  ;;  %v4639_v34 = vcombine.low %v479_v21, %v483_v22  ;;  %v535_v22 = vld [vmem:[%s5219_s3 + $0x9d8] sm:$0xff] }
 0x384   : > { %3992 = vmatprep.subr.bf16.mxu1 %v4846_v38  ;;  %v4648_v38 = vcombine.high %v487_v30, %v491_v39  ;;  %v663_v25 = vld [vmem:[%s5219_s3 + $0xdd8] sm:$0xff] }
 0x389   : > { %3829 = vmatpush1.bf16.xpose.msra.mxu0 %v4717_v36  ;;  %v627_v36 = vld [vmem:[%s5219_s3 + $0xcb8] sm:$0xff] }
 0x38a   : > { %3830 = vmatprep.subr.bf16.mxu0 %v4726_v48  ;;  %v4775_v48 = vcombine.low %v615_v32, %v619_v33  ;;  %v4784_v51 = vcombine.high %v623_v45, %v627_v36  ;;  %v547_v32 = vld [vmem:[%s5219_s3 + $0xa38] sm:$0xff] }
 0x38b   : > { %3993 = vmatpush1.bf16.xpose.msra.mxu1 %v4845_v46  ;;  %v4647_v46 = vcombine.low %v487_v30, %v491_v39  ;;  %v543_v39 = vld [vmem:[%s5219_s3 + $0xa18] sm:$0xff] }
 0x38c   : > { %3994 = vmatprep.subr.bf16.mxu1 %v4854_v49  ;;  %v4656_v49 = vcombine.high %v495_v43, %v499_v44  ;;  %v671_v33 = vld [vmem:[%s5219_s3 + $0xe18] sm:$0xff] }
 0x391   : > { %3831 = vmatpush1.bf16.xpose.msra.mxu0 %v4725_v55  ;;  %v635_v55 = vld [vmem:[%s5219_s3 + $0xcf8] sm:$0xff] }
 0x392   : > { %3832 = vmatprep.subr.bf16.mxu0 %v4734_v57  ;;  %v4783_v57 = vcombine.low %v623_v45, %v627_v36  ;;  %v4792_v59 = vcombine.high %v631_v54, %v635_v55  ;;  %v555_v45 = vld [vmem:[%s5219_s3 + $0xa78] sm:$0xff] }
 0x393   : > { %3995 = vmatpush1.bf16.xpose.msra.mxu1 %v4853_v56  ;;  %v4655_v56 = vcombine.low %v495_v43, %v499_v44  ;;  %v551_v44 = vld [vmem:[%s5219_s3 + $0xa58] sm:$0xff] }
 0x394   : > { %3996 = vmatprep.subr.bf16.mxu1 %v4862_v58  ;;  %v4664_v58 = vcombine.high %v503_v52, %v507_v53  ;;  %v679_v36 = vld [vmem:[%s5219_s3 + $0xe58] sm:$0xff] }
 0x399   : > { %3833 = vmatpush1.bf16.xpose.msra.mxu0 %v4733_v0  ;;  %v643_v0 = vld [vmem:[%s5219_s3 + $0xd38] sm:$0xff] }
 0x39a   : > { %3834 = vmatprep.subr.bf16.mxu0 %v4742_v2  ;;  %v4791_v2 = vcombine.low %v631_v54, %v635_v55  ;;  %v4800_v35 = vcombine.high %v639_v63, %v643_v0  ;;  %v563_v54 = vld [vmem:[%s5219_s3 + $0xab8] sm:$0xff] }
 0x39b   : > { %3997 = vmatpush1.bf16.xpose.msra.mxu1 %v4861_v1  ;;  %v4663_v1 = vcombine.low %v503_v52, %v507_v53  ;;  %v559_v53 = vld [vmem:[%s5219_s3 + $0xa98] sm:$0xff] }
 0x39c   : > { %3998 = vmatprep.subr.bf16.mxu1 %v4870_v3  ;;  %v4672_v3 = vcombine.high %v511_v60, %v515_v62  ;;  %v687_v55 = vld [vmem:[%s5219_s3 + $0xe98] sm:$0xff] }
 0x3a1   : > { %3835 = vmatpush1.bf16.xpose.msra.mxu0 %v4741_v7  ;;  %v651_v7 = vld [vmem:[%s5219_s3 + $0xd78] sm:$0xff] }
 0x3a2   : > { %3836 = vmatprep.subr.bf16.mxu0 %v4750_v9  ;;  %v4799_v9 = vcombine.low %v639_v63, %v643_v0  ;;  %v4808_v12 = vcombine.high %v647_v6, %v651_v7  ;;  %v571_v63 = vld [vmem:[%s5219_s3 + $0xaf8] sm:$0xff] }
 0x3a3   : > { %3999 = vmatpush1.bf16.xpose.msra.mxu1 %v4869_v8  ;;  %v4671_v8 = vcombine.low %v511_v60, %v515_v62  ;;  %v567_v62 = vld [vmem:[%s5219_s3 + $0xad8] sm:$0xff] }
 0x3a4   : > { %4000 = vmatprep.subr.bf16.mxu1 %v4878_v10  ;;  %v4680_v10 = vcombine.high %v519_v41, %v523_v5  ;;  %v695_v0 = vld [vmem:[%s5219_s3 + $0xed8] sm:$0xff] }
 0x3a9   : > { %3837 = vmatpush1.bf16.xpose.msra.mxu0 %v4749_v17  ;;  %v659_v17 = vld [vmem:[%s5219_s3 + $0xdb8] sm:$0xff] }
 0x3aa   : > { %3838 = vmatprep.subr.bf16.mxu0 %v4758_v19  ;;  %v4807_v19 = vcombine.low %v647_v6, %v651_v7  ;;  %v4816_v21 = vcombine.high %v655_v16, %v659_v17  ;;  %v579_v6 = vld [vmem:[%s5219_s3 + $0xb38] sm:$0xff] }
 0x3ab   : > { %4001 = vmatpush1.bf16.xpose.msra.mxu1 %v4877_v18  ;;  %v4679_v18 = vcombine.low %v519_v41, %v523_v5  ;;  %v575_v5 = vld [vmem:[%s5219_s3 + $0xb18] sm:$0xff] }
 0x3ac   : > { %4002 = vmatprep.subr.bf16.mxu1 %v4886_v20  ;;  %v4688_v20 = vcombine.high %v527_v14, %v531_v15  ;;  %v703_v7 = vld [vmem:[%s5219_s3 + $0xf18] sm:$0xff] }
 0x3b1   : > { %3839 = vmatpush1.bf16.xpose.msra.mxu0 %v4757_v26  ;;  %v667_v26 = vld [vmem:[%s5219_s3 + $0xdf8] sm:$0xff] }
 0x3b2   : > { %3849 = vmatprep.subr.bf16.mxu0 %v4640_v27  ;;  %v4815_v27 = vcombine.low %v655_v16, %v659_v17  ;;  %v4824_v30 = vcombine.high %v663_v25, %v667_v26  ;;  %v587_v16 = vld [vmem:[%s5219_s3 + $0xb78] sm:$0xff] }
 0x3b3   : > { %4003 = vmatpush1.bf16.xpose.msra.mxu1 %v4885_v28  ;;  %v4687_v28 = vcombine.low %v527_v14, %v531_v15  ;;  %v583_v15 = vld [vmem:[%s5219_s3 + $0xb58] sm:$0xff] }
 0x3b4   : > { %4013 = vmatprep.subr.bf16.mxu1 %v4768_v29  ;;  %v4696_v29 = vcombine.high %v535_v22, %v539_v24  ;;  %v711_v17 = vld [vmem:[%s5219_s3 + $0xf58] sm:$0xff] }
 0x3b8   : > { %3841 = vmatmul.mubr.bf16.vlgmr.msra.gmra.mrb[4].mxu0 %v5477_v61 }
 0x3b9   : > { %3850 = vmatpush1.bf16.xpose.msra.mxu0 %v4639_v34  ;;  %3881 = vmatprep.mubr.bf16.mxu0 %v5483_v4  ;;  %v675_v34 = vld [vmem:[%s5219_s3 + $0xe38] sm:$0xff] }
 0x3ba   : > { %4005 = vmatmul.mubr.bf16.vlgmr.msra.gmra.mrb[4].mxu1 %v5477_v61  ;;  %3851 = vmatprep.subr.bf16.mxu0 %v4648_v38  ;;  %v4823_v38 = vcombine.low %v663_v25, %v667_v26  ;;  %v4832_v43 = vcombine.high %v671_v33, %v675_v34  ;;  %v595_v25 = vld [vmem:[%s5219_s3 + $0xbb8] sm:$0xff] }
 0x3bb   : > { %4014 = vmatpush1.bf16.xpose.msra.mxu1 %v4767_v37  ;;  %4045 = vmatprep.mubr.bf16.mxu1 %v5483_v4  ;;  %v4695_v37 = vcombine.low %v535_v22, %v539_v24  ;;  %v591_v24 = vld [vmem:[%s5219_s3 + $0xb98] sm:$0xff] }
 0x3bc   : > { %4015 = vmatprep.subr.bf16.mxu1 %v4776_v40  ;;  %v4704_v40 = vcombine.high %v543_v39, %v547_v32  ;;  %v719_v26 = vld [vmem:[%s5219_s3 + $0xf98] sm:$0xff] }
 0x3c1   : > { %3852 = vmatpush1.bf16.xpose.msra.mxu0 %v4647_v46  ;;  %v683_v46 = vld [vmem:[%s5219_s3 + $0xe78] sm:$0xff] }
 0x3c2   : > { %3853 = vmatprep.subr.bf16.mxu0 %v4656_v49  ;;  %v4831_v49 = vcombine.low %v671_v33, %v675_v34  ;;  %v4840_v52 = vcombine.high %v679_v36, %v683_v46  ;;  %v603_v33 = vld [vmem:[%s5219_s3 + $0xbf8] sm:$0xff] }
 0x3c3   : > { %4016 = vmatpush1.bf16.xpose.msra.mxu1 %v4775_v48  ;;  %v4703_v48 = vcombine.low %v543_v39, %v547_v32  ;;  %v599_v32 = vld [vmem:[%s5219_s3 + $0xbd8] sm:$0xff] }
 0x3c4   : > { %4017 = vmatprep.subr.bf16.mxu1 %v4784_v51  ;;  %v4712_v51 = vcombine.high %v551_v44, %v555_v45  ;;  %v727_v34 = vld [vmem:[%s5219_s3 + $0xfd8] sm:$0xff] }
 0x3c9   : > { %3854 = vmatpush1.bf16.xpose.msra.mxu0 %v4655_v56  ;;  %v691_v56 = vld [vmem:[%s5219_s3 + $0xeb8] sm:$0xff] }
 0x3ca   : > { %3855 = vmatprep.subr.bf16.mxu0 %v4664_v58  ;;  %v4839_v58 = vcombine.low %v679_v36, %v683_v46  ;;  %v4848_v60 = vcombine.high %v687_v55, %v691_v56  ;;  %v738_v36 = vld [vmem:[%s5219_s3 + $0x1030] sm:$0xff]  ;;  %v732_v46 = vld [vmem:[%s5219_s3 + $0x1000] sm:$0xff] }
 0x3cb   : > { %4018 = vmatpush1.bf16.xpose.msra.mxu1 %v4783_v57  ;;  %v4711_v57 = vcombine.low %v551_v44, %v555_v45  ;;  %v734_v45 = vld [vmem:[%s5219_s3 + $0x1010] sm:$0xff] }
 0x3cc   : > { %4019 = vmatprep.subr.bf16.mxu1 %v4792_v59  ;;  %v4720_v59 = vcombine.high %v559_v53, %v563_v54 }
 0x3d1   : > { %3856 = vmatpush1.bf16.xpose.msra.mxu0 %v4663_v1  ;;  %v699_v1 = vld [vmem:[%s5219_s3 + $0xef8] sm:$0xff] }
 0x3d2   : > { %3857 = vmatprep.subr.bf16.mxu0 %v4672_v3  ;;  %v4847_v3 = vcombine.low %v687_v55, %v691_v56  ;;  %v4856_v41 = vcombine.high %v695_v0, %v699_v1  ;;  %v737_v55 = vld [vmem:[%s5219_s3 + $0x1028] sm:$0xff]  ;;  %v4893_v56 = vcombine.low %v734_v45, %v738_v36 }
 0x3d3   : > { %4020 = vmatpush1.bf16.xpose.msra.mxu1 %v4791_v2  ;;  %v4719_v2 = vcombine.low %v559_v53, %v563_v54  ;;  %v733_v54 = vld [vmem:[%s5219_s3 + $0x1008] sm:$0xff] }
 0x3d4   : > { %4021 = vmatprep.subr.bf16.mxu1 %v4800_v35  ;;  %v4728_v35 = vcombine.high %v567_v62, %v571_v63 }
 0x3d9   : > { %3858 = vmatpush1.bf16.xpose.msra.mxu0 %v4671_v8  ;;  %v707_v8 = vld [vmem:[%s5219_s3 + $0xf38] sm:$0xff] }
 0x3da   : > { %3859 = vmatprep.subr.bf16.mxu0 %v4680_v10  ;;  %v4855_v10 = vcombine.low %v695_v0, %v699_v1  ;;  %v4864_v14 = vcombine.high %v703_v7, %v707_v8  ;;  %v4891_v0 = vcombine.low %v733_v54, %v737_v55 }
 0x3db   : > { %4022 = vmatpush1.bf16.xpose.msra.mxu1 %v4799_v9  ;;  %v4727_v9 = vcombine.low %v567_v62, %v571_v63 }
 0x3dc   : > { %4023 = vmatprep.subr.bf16.mxu1 %v4808_v12  ;;  %v4736_v12 = vcombine.high %v575_v5, %v579_v6 }
 0x3e1   : > { %3860 = vmatpush1.bf16.xpose.msra.mxu0 %v4679_v18  ;;  %v715_v18 = vld [vmem:[%s5219_s3 + $0xf78] sm:$0xff] }
 0x3e2   : > { %3861 = vmatprep.subr.bf16.mxu0 %v4688_v20  ;;  %v4863_v20 = vcombine.low %v703_v7, %v707_v8  ;;  %v4872_v22 = vcombine.high %v711_v17, %v715_v18 }
 0x3e3   : > { %4024 = vmatpush1.bf16.xpose.msra.mxu1 %v4807_v19  ;;  %v4735_v19 = vcombine.low %v575_v5, %v579_v6 }
 0x3e4   : > { %4025 = vmatprep.subr.bf16.mxu1 %v4816_v21  ;;  %v4744_v21 = vcombine.high %v583_v15, %v587_v16 }
 0x3e9   : > { %3862 = vmatpush1.bf16.xpose.msra.mxu0 %v4687_v28  ;;  %v723_v28 = vld [vmem:[%s5219_s3 + $0xfb8] sm:$0xff] }
 0x3ea   : > { %3863 = vmatprep.subr.bf16.mxu0 %v4696_v29  ;;  %v4871_v29 = vcombine.low %v711_v17, %v715_v18  ;;  %v4880_v39 = vcombine.high %v719_v26, %v723_v28 }
 0x3eb   : > { %4026 = vmatpush1.bf16.xpose.msra.mxu1 %v4815_v27  ;;  %v4743_v27 = vcombine.low %v583_v15, %v587_v16 }
 0x3ec   : > { %4027 = vmatprep.subr.bf16.mxu1 %v4824_v30  ;;  %v4752_v30 = vcombine.high %v591_v24, %v595_v25 }
 0x3f1   : > { %3864 = vmatpush1.bf16.xpose.msra.mxu0 %v4695_v37  ;;  %v731_v37 = vld [vmem:[%s5219_s3 + $0xff8] sm:$0xff] }
 0x3f2   : > { %3865 = vmatprep.subr.bf16.mxu0 %v4704_v40  ;;  %v4879_v40 = vcombine.low %v719_v26, %v723_v28  ;;  %v4888_v44 = vcombine.high %v727_v34, %v731_v37 }
 0x3f3   : > { %4028 = vmatpush1.bf16.xpose.msra.mxu1 %v4823_v38  ;;  %v4751_v38 = vcombine.low %v591_v24, %v595_v25 }
 0x3f4   : > { %4029 = vmatprep.subr.bf16.mxu1 %v4832_v43  ;;  %v4760_v43 = vcombine.high %v599_v32, %v603_v33 }
 0x3f9   : > { %3866 = vmatpush1.bf16.xpose.msra.mxu0 %v4703_v48  ;;  %v736_v48 = vld [vmem:[%s5219_s3 + $0x1020] sm:$0xff] }
 0x3fa   : > { %3867 = vmatprep.subr.bf16.mxu0 %v4712_v51  ;;  %v4887_v51 = vcombine.low %v727_v34, %v731_v37  ;;  %v4890_v53 = vcombine.high %v732_v46, %v736_v48 }
 0x3fb   : > { %4030 = vmatpush1.bf16.xpose.msra.mxu1 %v4831_v49  ;;  %v4759_v49 = vcombine.low %v599_v32, %v603_v33 }
 0x3fc   : > { %4031 = vmatprep.subr.bf16.mxu1 %v4840_v52  ;;  %v4894_v52 = vcombine.high %v734_v45, %v738_v36 }
 0x401   : > { %3868 = vmatpush1.bf16.xpose.msra.mxu0 %v4711_v57  ;;  %v735_v57 = vld [vmem:[%s5219_s3 + $0x1018] sm:$0xff] }
 0x402   : > { %3869 = vmatprep.subr.bf16.mxu0 %v4720_v59  ;;  %v4889_v59 = vcombine.low %v732_v46, %v736_v48 }
 0x403   : > { %4032 = vmatpush1.bf16.xpose.msra.mxu1 %v4839_v58  ;;  %v739_v58 = vld [vmem:[%s5219_s3 + $0x1038] sm:$0xff] }
 0x404   : > { %4033 = vmatprep.subr.bf16.mxu1 %v4848_v60  ;;  %v4892_v60 = vcombine.high %v733_v54, %v737_v55  ;;  %v4896_v62 = vcombine.high %v735_v57, %v739_v58  ;;  %v4895_v63 = vcombine.low %v735_v57, %v739_v58 }
 0x409   : > { %3870 = vmatpush1.bf16.xpose.msra.mxu0 %v4719_v2 }
 0x40a   : > { %3871 = vmatprep.subr.bf16.mxu0 %v4728_v35 }
 0x40b   : > { %4034 = vmatpush1.bf16.xpose.msra.mxu1 %v4847_v3 }
 0x40c   : > { %4035 = vmatprep.subr.bf16.mxu1 %v4856_v41 }
 0x411   : > { %3872 = vmatpush1.bf16.xpose.msra.mxu0 %v4727_v9 }
 0x412   : > { %3873 = vmatprep.subr.bf16.mxu0 %v4736_v12 }
 0x413   : > { %4036 = vmatpush1.bf16.xpose.msra.mxu1 %v4855_v10 }
 0x414   : > { %4037 = vmatprep.subr.bf16.mxu1 %v4864_v14 }
 0x419   : > { %3874 = vmatpush1.bf16.xpose.msra.mxu0 %v4735_v19 }
 0x41a   : > { %3875 = vmatprep.subr.bf16.mxu0 %v4744_v21 }
 0x41b   : > { %4038 = vmatpush1.bf16.xpose.msra.mxu1 %v4863_v20 }
 0x41c   : > { %4039 = vmatprep.subr.bf16.mxu1 %v4872_v22 }
 0x421   : > { %3876 = vmatpush1.bf16.xpose.msra.mxu0 %v4743_v27 }
 0x422   : > { %3877 = vmatprep.subr.bf16.mxu0 %v4752_v30 }
 0x423   : > { %4040 = vmatpush1.bf16.xpose.msra.mxu1 %v4871_v29 }
 0x424   : > { %4041 = vmatprep.subr.bf16.mxu1 %v4880_v39 }
 0x429   : > { %3878 = vmatpush1.bf16.xpose.msra.mxu0 %v4751_v38 }
 0x42a   : > { %3879 = vmatprep.subr.bf16.mxu0 %v4760_v43 }
 0x42b   : > { %4042 = vmatpush1.bf16.xpose.msra.mxu1 %v4879_v40 }
 0x42c   : > { %4043 = vmatprep.subr.bf16.mxu1 %v4888_v44 }
 0x431   : > { %3880 = vmatpush1.bf16.xpose.msra.mxu0 %v4759_v49 }
 0x432   : > { %4134 = vmatprep.subr.bf16.mxu0 %v4894_v52 }
 0x433   : > { %4044 = vmatpush1.bf16.xpose.msra.mxu1 %v4887_v51 }
 0x434   : > { %4054 = vmatprep.subr.bf16.mxu1 %v4890_v53 }
 0x438   : > { %3882 = vmatmul.mubr.bf16.vlgmr.msra.gmra.mrb[4].mxu0 %v5553_v13 }
 0x439   : > { %4135 = vmatpush1.bf16.xpose.msra.mxu0 %v4893_v56  ;;  %4166 = vmatprep.mubr.bf16.mxu0 %v5407_v50 }
 0x43a   : > { %4046 = vmatmul.mubr.bf16.vlgmr.msra.gmra.mrb[4].mxu1 %v5553_v13  ;;  %4174 = vmatprep.subr.bf16.mxu0 %v4896_v62 }
 0x43b   : > { %4055 = vmatpush1.bf16.xpose.msra.mxu1 %v4889_v59  ;;  %4086 = vmatprep.mubr.bf16.mxu1 %v5263_v47  ;;  %v5110_v47 = vmov 0.0  }
 0x43c   : > { %4094 = vmatprep.subr.bf16.mxu1 %v4892_v60  ;;  %215 = vst.msk [vmem:[#allocation2 + $0x10] sm:$0x3] %vm214_vm0, %v5110_v47 }
 0x440   : > { %4167 = vmatmul.mubr.bf16.vlgmr.msra.gmra.mrb[8].mxu0 %v5477_v61 }
 0x441   : > { %4175 = vmatpush1.bf16.xpose.msra.mxu0 %v4895_v63  ;;  %4206 = vmatprep.mubr.bf16.mxu0 %v5483_v4 }
 0x442   : > { %4087 = vmatmul.mubr.bf16.vlgmr.msra.gmra.mrb[8].mxu1 %v5319_v23 }
 0x443   : > { %4095 = vmatpush1.bf16.xpose.msra.mxu1 %v4891_v0  ;;  %4126 = vmatprep.mubr.bf16.mxu1 %v5325_v31  ;;  %v218_v14 = vld [vmem:[#allocation2 + $0x10] sm:$0x3] }
 0x44c   : > { %4207 = vmatmul.mubr.bf16.vlgmr.msra.gmra.mrb[8].mxu0 %v5553_v13 }
 0x44e   : > { %4127 = vmatmul.mubr.bf16.vlgmr.msra.gmra.mrb[8].mxu1 %v5400_v42 }
 0x50b   : > { %v3883_v50 = vpop.f32.mrb[4].mxu0 }
 0x50c   : > { %v3885_v61 = vpop.f32.mrb[5].mxu0 }
 0x50d   : > { %v4047_v1 = vpop.f32.mrb[4].mxu1  ;;  %v4240_v2 = vcombine.low %v3883_v50, %v3885_v61  ;;  %v3887_v3 = vpop.f32.mrb[6].mxu0 }
 0x50e   : > { %v4049_v23 = vpop.f32.mrb[5].mxu1  ;;  %v3888_v31 = vpop.f32.mrb[7].mxu0 }
 0x50f   : > { %v4241_v35 = vcombine.low %v4047_v1, %v4049_v23  ;;  %v4051_v41 = vpop.f32.mrb[6].mxu1  ;;  %v4248_v4 = vrot.slane %v4240_v2, %v5670_v11 }
 0x510   : > { %v4052_v5 = vpop.f32.mrb[7].mxu1 }
 0x511   : > { %v4255_v13 = vrot.slane %v4241_v35, %v5670_v11 }
 0x513   : > { %v4256_v42 = vcombine.low %v4248_v4, %v4255_v13 }
 0x515   : > { %4281 = vst [vmem:[%s5689_s6 + $0x8] sm:$0xff] %v4256_v42 }
 0x51f   : > { %v4208_v6 = vpop.f32.mrb[8].mxu0 }
 0x520   : > { %v4210_v8 = vpop.f32.mrb[9].mxu0 }
 0x521   : > { %v4128_v7 = vpop.f32.mrb[8].mxu1  ;;  %v4211_v12 = vpop.f32.mrb[10].mxu0 }
 0x522   : > { %v4900_v9 = vadd.f32 %v4208_v6, %v4128_v7  ;;  %v4130_v10 = vpop.f32.mrb[9].mxu1  ;;  %v4212_v16 = vpop.f32.mrb[11].mxu0 }
 0x523   : > { %v4131_v15 = vpop.f32.mrb[10].mxu1 }
 0x524   : > { %v4263_v17 = vrot.slane %v4900_v9, %v5670_v11  ;;  %v4132_v18 = vpop.f32.mrb[11].mxu1 }
 0x526   : > { %v4269_v19 = vadd.f32 %v4263_v17, %v218_v14 }
 0x528   : > { %4273 = vst.msk [vmem:[#allocation2 + $0x10] sm:$0x3] %vm214_vm0, %v4269_v19 }
 0x52f   : > { %v4279_v20 = vld [vmem:[#allocation2 + $0x10] sm:$0x3] }
 0x530   : > { %4282 = vst.msk [vmem:[%s5689_s6 + $0x10] sm:$0x3] %vm214_vm0, %v4279_v20 }
 0x531 PF: > { %s15_s14 = sadd.s32 1, %s5102_s14   ;;  %s5884_s9 = smov %s5086_s10 }
 0x532   : > { %p12_p10 = scmp.ge.s32.totalorder %s15_s14, 4   ;;  %s5885_s10 = smov %s5090_s11 }
 0x533   : > { %s5886_s11 = smov %s5171_s20  ;;  %s5887_s12 = smov %s5098_s13 }
 0x534   : > { %s5888_s13 = smov %s5890_s16  ;;  %14 = sbr.rel (!%p12_p10) target bundleno = 4 (0x4), region = 79 }
 0x53b   :  { %4304 = vsyncpa [#allocation4], 1 }
 0x53c   :  { %4306 = vsyncpa [#allocation4 + $0x1], 1 }

</bundles_post_ra>
